<compile_context>
chip_gen: v7x
topology: tpu7x:2x2x1
jax: 0.10.0
libtpu: 0.0.40
codegen_flags: <defaults>
</compile_context>

<pallas_src>
import functools

import jax
import jax.numpy as jnp
import numpy as np
from jax.experimental import pallas as pl
from jax.experimental.pallas import tpu as pltpu


# --------------------------------------------------------------------------------------
# Fused kernel: one grid step handles TM (batch*src) rows and their NN neighbors each.
# --------------------------------------------------------------------------------------
def _attn_model_kernel(
    q_ref,      # (TM, DM)        f32  concatenated query features (also the residual)
    k_ref,      # (TM*NN, DM)     f32  concatenated neighbor features (keys == values)
    mask_ref,   # (TM, H*NN)      i32  1 -> masked (null neighbor), head blocks along lanes
    wq_ref,     # (DM, H*DK)      f32
    wk_ref,     # (DM, H*DK)      f32
    wv_ref,     # (DM, H*DV)      f32
    wfc_ref,    # (H*DV, DM)      f32
    bfc_ref,    # (1, DM)         f32
    g_ref,      # (1, DM)         f32  layernorm gamma
    b_ref,      # (1, DM)         f32  layernorm beta
    w1a_ref,    # (DM, F)         f32  merger fc1 weight (attention-output part)
    w1b_ref,    # (F, F)          f32  merger fc1 weight (src part)
    b1_ref,     # (1, F)          f32
    w2_ref,     # (F, F)          f32
    b2_ref,     # (1, F)          f32
    z_ref,      # out (TM, F)     f32
    attn_ref,   # out (TM, H*NN)  f32
    *, n_head, nn, d_k, d_v, inv_temp, eps,
):
    q_in = q_ref[...]                         # (TM, DM)
    k_in = k_ref[...]                         # (TM*NN, DM)
    tm = q_in.shape[0]

    # Input projections on the MXU, f32 accumulation.
    qp = jnp.dot(q_in, wq_ref[...], preferred_element_type=jnp.float32)   # (TM, H*DK)
    kp = jnp.dot(k_in, wk_ref[...], preferred_element_type=jnp.float32)   # (TM*NN, H*DK)
    vp = jnp.dot(k_in, wv_ref[...], preferred_element_type=jnp.float32)   # (TM*NN, H*DV)

    mask = mask_ref[...]                      # (TM, H*NN) int32

    head_outs = []
    for h in range(n_head):                   # static unroll over heads
        qh = qp[:, h * d_k:(h + 1) * d_k]                        # (TM, DK)
        kh = kp[:, h * d_k:(h + 1) * d_k].reshape(tm, nn, d_k)   # (TM, NN, DK)
        vh = vp[:, h * d_v:(h + 1) * d_v].reshape(tm, nn, d_v)   # (TM, NN, DV)

        # Scaled dot product: one query per (batch, src) row.
        scores = jnp.sum(qh[:, None, :] * kh, axis=-1) * inv_temp          # (TM, NN)
        mh = mask[:, h * nn:(h + 1) * nn]
        scores = jnp.where(mh != 0, jnp.float32(-1e10), scores)            # masked_fill
        smax = jnp.max(scores, axis=-1, keepdims=True)
        e = jnp.exp(scores - smax)
        p = e / jnp.sum(e, axis=-1, keepdims=True)                         # softmax
        # TODO(synk): dropout on attention weights / fc output omitted (eval mode).
        attn_ref[:, h * nn:(h + 1) * nn] = p
        head_outs.append(jnp.sum(p[:, :, None] * vh, axis=1))              # (TM, DV)

    out = jnp.concatenate(head_outs, axis=-1)                              # (TM, H*DV)
    out = jnp.dot(out, wfc_ref[...], preferred_element_type=jnp.float32) + bfc_ref[...]
    out = out + q_in                                                       # residual

    # LayerNorm over model_dim (biased variance, eps=1e-5 -> torch semantics).
    mu = jnp.mean(out, axis=-1, keepdims=True)
    xc = out - mu
    var = jnp.mean(xc * xc, axis=-1, keepdims=True)
    normed = xc * jax.lax.rsqrt(var + eps) * g_ref[...] + b_ref[...]

    # MergeLayer (non_linear=True): fc2(relu(fc1(cat([attn_out, src], -1)))).
    # cat + fc1 is expressed as a split matmul to avoid an in-kernel concatenate.
    feat = z_ref.shape[-1]
    src_blk = q_in[:, :feat]                  # src occupies the first `feat` lanes of q_in
    h1 = (jnp.dot(normed, w1a_ref[...], preferred_element_type=jnp.float32)
          + jnp.dot(src_blk, w1b_ref[...], preferred_element_type=jnp.float32)
          + b1_ref[...])
    h1 = jnp.maximum(h1, 0.0)
    z_ref[...] = jnp.dot(h1, w2_ref[...], preferred_element_type=jnp.float32) + b2_ref[...]


# --------------------------------------------------------------------------------------
# Wrapper: layout plumbing (concat / reshape / mask remap / padding) + pallas_call.
# --------------------------------------------------------------------------------------
def attn_model_forward(params, src, src_t, src_p, seq, seq_t, seq_e, seq_p, mask,
                       *, n_head=2, tile_rows=8):
    B, N_src, feat_dim = src.shape
    N_ngh = seq.shape[1]
    assert N_ngh % N_src == 0
    nn_ = N_ngh // N_src
    edge_dim = seq_e.shape[-1]

    # src_e is an all-zero tensor: build with jnp.zeros so XLA fuses it into the concat
    # (perf feedback: never spend a Pallas kernel / HBM roundtrip on a pure zero-fill).
    src_e = jnp.zeros((B, N_src, edge_dim), jnp.float32)
    q_in = jnp.concatenate([src, src_e, src_t, src_p], axis=-1)   # (B, N_src, model_dim)
    k_in = jnp.concatenate([seq, seq_e, seq_t, seq_p], axis=-1)   # (B, N_ngh, model_dim)
    model_dim = q_in.shape[-1]
    assert model_dim % n_head == 0
    d_k = model_dim // n_head
    d_v = d_k

    M = B * N_src
    q2 = q_in.reshape(M, model_dim)
    k3 = k_in.reshape(M, nn_, model_dim)

    # Reproduce torch's `mask.view(B*N_src,1,nn).repeat(n_head,1,1)` row ordering exactly:
    # attention row i = bs*n_head + h is masked with mask_flat[i % (B*N_src)].
    mask_flat = mask.reshape(M, nn_)
    rows = jnp.arange(M * n_head)
    mask2d = mask_flat[rows % M].astype(jnp.int32).reshape(M, n_head * nn_)

    # Pad the row axis to a sublane-aligned multiple of the tile so every block is full.
    TM = tile_rows
    Mp = ((M + TM - 1) // TM) * TM
    pad = Mp - M
    if pad:
        q2 = jnp.pad(q2, ((0, pad), (0, 0)))
        k3 = jnp.pad(k3, ((0, pad), (0, 0), (0, 0)))
        mask2d = jnp.pad(mask2d, ((0, pad), (0, 0)))
    kin2 = k3.reshape(Mp * nn_, model_dim)

    kernel = functools.partial(
        _attn_model_kernel,
        n_head=n_head, nn=nn_, d_k=d_k, d_v=d_v,
        inv_temp=float(1.0 / np.power(d_k, 0.5)), eps=1e-5)

    weight_args = (params["wq"], params["wk"], params["wv"], params["wfc"],
                   params["bfc"], params["ln_g"], params["ln_b"],
                   params["w1a"], params["w1b"], params["b1"],
                   params["w2"], params["b2"])

    grid = (Mp // TM,)
    in_specs = [
        pl.BlockSpec((TM, model_dim), lambda i: (i, 0)),         # q / residual block
        pl.BlockSpec((TM * nn_, model_dim), lambda i: (i, 0)),   # neighbor (k==v) block
        pl.BlockSpec((TM, n_head * nn_), lambda i: (i, 0)),      # mask block
    ] + [pl.BlockSpec(w.shape, lambda i: (0, 0)) for w in weight_args]  # resident weights

    out_shape = (jax.ShapeDtypeStruct((Mp, feat_dim), jnp.float32),
                 jax.ShapeDtypeStruct((Mp, n_head * nn_), jnp.float32))
    out_specs = (pl.BlockSpec((TM, feat_dim), lambda i: (i, 0)),
                 pl.BlockSpec((TM, n_head * nn_), lambda i: (i, 0)))

    z_p, attn_p = pl.pallas_call(
        kernel,
        out_shape=out_shape,
        grid=grid,
        in_specs=in_specs,
        out_specs=out_specs,
        compiler_params=pltpu.CompilerParams(
            dimension_semantics=("parallel",)),      # row blocks are independent (megacore)
    )(q2, kin2, mask2d, *weight_args)

    z = z_p[:M].reshape(B, N_src, feat_dim)
    attn_map = attn_p[:M].reshape(B, N_src, n_head, nn_)
    return (z, None), attn_map                       # MergeLayer returns (z, z_walk=None)


# --------------------------------------------------------------------------------------
# Parameters + pure-JAX reference (exact replication of the torch math, eval mode).
# --------------------------------------------------------------------------------------
def init_params(key, feat_dim, edge_dim, time_dim, pos_dim, n_head):
    model_dim = feat_dim + edge_dim + time_dim + pos_dim
    d_k = model_dim // n_head
    ks = jax.random.split(key, 8)
    s_qk = np.sqrt(2.0 / (model_dim + d_k))
    return dict(
        wq=jax.random.normal(ks[0], (model_dim, n_head * d_k), jnp.float32) * s_qk,
        wk=jax.random.normal(ks[1], (model_dim, n_head * d_k), jnp.float32) * s_qk,
        wv=jax.random.normal(ks[2], (model_dim, n_head * d_k), jnp.float32) * s_qk,
        wfc=jax.random.normal(ks[3], (n_head * d_k, model_dim), jnp.float32)
            * np.sqrt(2.0 / (n_head * d_k + model_dim)),
        bfc=jnp.zeros((1, model_dim), jnp.float32),
        ln_g=jnp.ones((1, model_dim), jnp.float32),
        ln_b=jnp.zeros((1, model_dim), jnp.float32),
        w1a=jax.random.normal(ks[4], (model_dim, feat_dim), jnp.float32)
            * np.sqrt(1.0 / (model_dim + feat_dim)),
        w1b=jax.random.normal(ks[5], (feat_dim, feat_dim), jnp.float32)
            * np.sqrt(1.0 / (model_dim + feat_dim)),
        b1=jax.random.normal(ks[6], (1, feat_dim), jnp.float32) * 0.01,
        w2=jax.random.normal(ks[7], (feat_dim, feat_dim), jnp.float32)
            * np.sqrt(1.0 / feat_dim),
        b2=jnp.zeros((1, feat_dim), jnp.float32),
    )


def attn_model_ref(params, src, src_t, src_p, seq, seq_t, seq_e, seq_p, mask, *, n_head=2):
    B, N_src, feat_dim = src.shape
    N_ngh = seq.shape[1]
    nn_ = N_ngh // N_src
    edge_dim = seq_e.shape[-1]
    hp = jax.lax.Precision.HIGHEST

    src_e = jnp.zeros((B, N_src, edge_dim), jnp.float32)
    q_in = jnp.concatenate([src, src_e, src_t, src_p], axis=-1)
    k_in = jnp.concatenate([seq, seq_e, seq_t, seq_p], axis=-1)
    DM = q_in.shape[-1]
    d_k = DM // n_head
    d_v = d_k

    qp = jnp.einsum('bsd,de->bse', q_in, params['wq'], precision=hp)
    kp = jnp.einsum('bnd,de->bne', k_in, params['wk'], precision=hp)
    vp = jnp.einsum('bnd,de->bne', k_in, params['wv'], precision=hp)

    R = B * N_src * n_head
    q_r = qp.reshape(B, N_src, 1, n_head, d_k).transpose(0, 1, 3, 2, 4).reshape(R, 1, d_k)
    k_r = kp.reshape(B, N_src, nn_, n_head, d_k).transpose(0, 1, 3, 2, 4).reshape(R, nn_, d_k)
    v_r = vp.reshape(B, N_src, nn_, n_head, d_v).transpose(0, 1, 3, 2, 4).reshape(R, nn_, d_v)

    attn = jnp.einsum('rqd,rnd->rqn', q_r, k_r, precision=hp) / np.power(d_k, 0.5)
    mask_rep = jnp.tile(mask.reshape(B * N_src, 1, nn_), (n_head, 1, 1))
    attn = jnp.where(mask_rep, -1e10, attn)
    attn = jax.nn.softmax(attn, axis=2)
    out = jnp.einsum('rqn,rnd->rqd', attn, v_r, precision=hp).reshape(B, N_src, n_head * d_v)
    out = jnp.einsum('bse,ed->bsd', out, params['wfc'], precision=hp) + params['bfc'][0]
    out = out + q_in
    mu = jnp.mean(out, axis=-1, keepdims=True)
    xc = out - mu
    var = jnp.mean(xc * xc, axis=-1, keepdims=True)
    out = xc * jax.lax.rsqrt(var + 1e-5) * params['ln_g'][0] + params['ln_b'][0]

    x = jnp.concatenate([out, src], axis=-1)
    w1_full = jnp.concatenate([params['w1a'], params['w1b']], axis=0)
    h = jax.nn.relu(jnp.einsum('bsd,df->bsf', x, w1_full, precision=hp) + params['b1'][0])
    z = jnp.einsum('bsf,fg->bsg', h, params['w2'], precision=hp) + params['b2'][0]
    attn_map = attn.reshape(B, N_src, n_head, nn_)
    return (z, None), attn_map


if __name__ == "__main__":
    key = jax.random.PRNGKey(0)
    B, N_src, num_neighbors = 2, 5, 8
    feat_dim = edge_dim = time_dim = pos_dim = 32          # model_dim = 128 (lane-dense)
    n_head = 2
    N_ngh = N_src * num_neighbors

    k_data, k_par = jax.random.split(key)
    ks = jax.random.split(k_data, 8)
    src   = jax.random.normal(ks[0], (B, N_src, feat_dim), jnp.float32)
    src_t = jax.random.normal(ks[1], (B, N_src, time_dim), jnp.float32)
    src_p = jax.random.normal(ks[2], (B, N_src, pos_dim), jnp.float32)
    seq   = jax.random.normal(ks[3], (B, N_ngh, feat_dim), jnp.float32)
    seq_t = jax.random.normal(ks[4], (B, N_ngh, time_dim), jnp.float32)
    seq_e = jax.random.normal(ks[5], (B, N_ngh, edge_dim), jnp.float32)
    seq_p = jax.random.normal(ks[6], (B, N_ngh, pos_dim), jnp.float32)
    mask  = jax.random.uniform(ks[7], (B, N_ngh)) < 0.3    # True = null neighbor

    params = init_params(k_par, feat_dim, edge_dim, time_dim, pos_dim, n_head)

    (z, z_walk), attn = attn_model_forward(
        params, src, src_t, src_p, seq, seq_t, seq_e, seq_p, mask, n_head=n_head)
    z, attn = jax.block_until_ready((z, attn))

    (z_ref, _), attn_ref = attn_model_ref(
        params, src, src_t, src_p, seq, seq_t, seq_e, seq_p, mask, n_head=n_head)

    assert z.shape == (B, N_src, feat_dim), z.shape
    assert attn.shape == (B, N_src, n_head, num_neighbors), attn.shape
    assert z.dtype == jnp.float32 and attn.dtype == jnp.float32
    assert bool(jnp.all(jnp.isfinite(z))) and bool(jnp.all(jnp.isfinite(attn)))
    assert bool(jnp.allclose(attn.sum(-1), 1.0, atol=1e-4))
    assert bool(jnp.allclose(attn, attn_ref, rtol=2e-2, atol=2e-2)), \
        float(jnp.max(jnp.abs(attn - attn_ref)))
    assert bool(jnp.allclose(z, z_ref, rtol=2e-2, atol=2e-2)), \
        float(jnp.max(jnp.abs(z - z_ref)))

    print("KERNEL_OK")
</pallas_src>

<mosaic_0001>
module attributes {stable_mosaic.version = 11 : i64} {
  func.func @_attn_model_kernel(%arg0: i32, %arg1: memref<8x128xf32, #tpu.memory_space<vmem>>, %arg2: memref<64x128xf32, #tpu.memory_space<vmem>>, %arg3: memref<8x16xi32, #tpu.memory_space<vmem>>, %arg4: memref<128x128xf32, #tpu.memory_space<vmem>>, %arg5: memref<128x128xf32, #tpu.memory_space<vmem>>, %arg6: memref<128x128xf32, #tpu.memory_space<vmem>>, %arg7: memref<128x128xf32, #tpu.memory_space<vmem>>, %arg8: memref<1x128xf32, #tpu.memory_space<vmem>>, %arg9: memref<1x128xf32, #tpu.memory_space<vmem>>, %arg10: memref<1x128xf32, #tpu.memory_space<vmem>>, %arg11: memref<128x32xf32, #tpu.memory_space<vmem>>, %arg12: memref<32x32xf32, #tpu.memory_space<vmem>>, %arg13: memref<1x32xf32, #tpu.memory_space<vmem>>, %arg14: memref<32x32xf32, #tpu.memory_space<vmem>>, %arg15: memref<1x32xf32, #tpu.memory_space<vmem>>, %arg16: memref<8x32xf32, #tpu.memory_space<vmem>>, %arg17: memref<8x16xf32, #tpu.memory_space<vmem>>) attributes {dimension_semantics = [#tpu.dimension_semantics<parallel>], iteration_bounds = array<i64: 2>, scalar_prefetch = 0 : i64, scratch_operands = 0 : i64, tpu.core_type = #tpu.core_type<tc>, window_params = [{transform_indices = @transform_0, window_bounds = array<i64: 8, 128>}, {transform_indices = @transform_1, window_bounds = array<i64: 64, 128>}, {transform_indices = @transform_2, window_bounds = array<i64: 8, 16>}, {pipeline_mode = #tpu.pipeline_mode<synchronous>, transform_indices = @transform_3, window_bounds = array<i64: 128, 128>}, {pipeline_mode = #tpu.pipeline_mode<synchronous>, transform_indices = @transform_4, window_bounds = array<i64: 128, 128>}, {pipeline_mode = #tpu.pipeline_mode<synchronous>, transform_indices = @transform_5, window_bounds = array<i64: 128, 128>}, {pipeline_mode = #tpu.pipeline_mode<synchronous>, transform_indices = @transform_6, window_bounds = array<i64: 128, 128>}, {pipeline_mode = #tpu.pipeline_mode<synchronous>, transform_indices = @transform_7, window_bounds = array<i64: 1, 128>}, {pipeline_mode = #tpu.pipeline_mode<synchronous>, transform_indices = @transform_8, window_bounds = array<i64: 1, 128>}, {pipeline_mode = #tpu.pipeline_mode<synchronous>, transform_indices = @transform_9, window_bounds = array<i64: 1, 128>}, {pipeline_mode = #tpu.pipeline_mode<synchronous>, transform_indices = @transform_10, window_bounds = array<i64: 128, 32>}, {pipeline_mode = #tpu.pipeline_mode<synchronous>, transform_indices = @transform_11, window_bounds = array<i64: 32, 32>}, {pipeline_mode = #tpu.pipeline_mode<synchronous>, transform_indices = @transform_12, window_bounds = array<i64: 1, 32>}, {pipeline_mode = #tpu.pipeline_mode<synchronous>, transform_indices = @transform_13, window_bounds = array<i64: 32, 32>}, {pipeline_mode = #tpu.pipeline_mode<synchronous>, transform_indices = @transform_14, window_bounds = array<i64: 1, 32>}, {transform_indices = @transform_15, window_bounds = array<i64: 8, 32>}, {transform_indices = @transform_16, window_bounds = array<i64: 8, 16>}]} {
    %c0 = arith.constant 0 : index
    %c0_0 = arith.constant 0 : index
    %0 = vector.load %arg1[%c0, %c0_0] : memref<8x128xf32, #tpu.memory_space<vmem>>, vector<8x128xf32>
    %c0_1 = arith.constant 0 : index
    %c0_2 = arith.constant 0 : index
    %1 = vector.load %arg2[%c0_1, %c0_2] : memref<64x128xf32, #tpu.memory_space<vmem>>, vector<64x128xf32>
    %c0_3 = arith.constant 0 : index
    %c0_4 = arith.constant 0 : index
    %2 = vector.load %arg4[%c0_3, %c0_4] : memref<128x128xf32, #tpu.memory_space<vmem>>, vector<128x128xf32>
    %cst = arith.constant dense<0.000000e+00> : vector<8x128xf32>
    %3 = tpu.matmul %0, %2, %cst {dimension_numbers = #tpu.dot_dimension_numbers<[1], [0], [0], [1], [0, 0, 1, 1], [], []>} : vector<8x128xf32>, vector<128x128xf32>, vector<8x128xf32> -> vector<8x128xf32>
    %c0_5 = arith.constant 0 : index
    %c0_6 = arith.constant 0 : index
    %4 = vector.load %arg5[%c0_5, %c0_6] : memref<128x128xf32, #tpu.memory_space<vmem>>, vector<128x128xf32>
    %cst_7 = arith.constant dense<0.000000e+00> : vector<64x128xf32>
    %5 = tpu.matmul %1, %4, %cst_7 {dimension_numbers = #tpu.dot_dimension_numbers<[1], [0], [0], [1], [0, 0, 1, 1], [], []>} : vector<64x128xf32>, vector<128x128xf32>, vector<64x128xf32> -> vector<64x128xf32>
    %c0_8 = arith.constant 0 : index
    %c0_9 = arith.constant 0 : index
    %6 = vector.load %arg6[%c0_8, %c0_9] : memref<128x128xf32, #tpu.memory_space<vmem>>, vector<128x128xf32>
    %cst_10 = arith.constant dense<0.000000e+00> : vector<64x128xf32>
    %7 = tpu.matmul %1, %6, %cst_10 {dimension_numbers = #tpu.dot_dimension_numbers<[1], [0], [0], [1], [0, 0, 1, 1], [], []>} : vector<64x128xf32>, vector<128x128xf32>, vector<64x128xf32> -> vector<64x128xf32>
    %c0_11 = arith.constant 0 : index
    %c0_12 = arith.constant 0 : index
    %8 = vector.load %arg3[%c0_11, %c0_12] : memref<8x16xi32, #tpu.memory_space<vmem>>, vector<8x16xi32>
    %9 = vector.extract_strided_slice %3 {offsets = [0, 0], sizes = [8, 64], strides = [1, 1]} : vector<8x128xf32> to vector<8x64xf32>
    %10 = vector.extract_strided_slice %5 {offsets = [0, 0], sizes = [64, 64], strides = [1, 1]} : vector<64x128xf32> to vector<64x64xf32>
    %11 = vector.shape_cast %10 : vector<64x64xf32> to vector<8x8x64xf32>
    %12 = vector.extract_strided_slice %7 {offsets = [0, 0], sizes = [64, 64], strides = [1, 1]} : vector<64x128xf32> to vector<64x64xf32>
    %13 = vector.shape_cast %12 : vector<64x64xf32> to vector<8x8x64xf32>
    %14 = vector.shape_cast %9 : vector<8x64xf32> to vector<8x1x64xf32>
    %15 = vector.broadcast %14 : vector<8x1x64xf32> to vector<8x8x64xf32>
    %16 = arith.mulf %15, %11 : vector<8x8x64xf32>
    %cst_13 = arith.constant dense<0.000000e+00> : vector<8x8xf32>
    %17 = vector.multi_reduction <add>, %16, %cst_13 [2] : vector<8x8x64xf32> to vector<8x8xf32>
    %cst_14 = arith.constant 1.250000e-01 : f32
    %18 = vector.broadcast %cst_14 : f32 to vector<8x8xf32>
    %19 = arith.mulf %17, %18 : vector<8x8xf32>
    %20 = vector.extract_strided_slice %8 {offsets = [0, 0], sizes = [8, 8], strides = [1, 1]} : vector<8x16xi32> to vector<8x8xi32>
    %c0_i32 = arith.constant 0 : i32
    %21 = vector.broadcast %c0_i32 : i32 to vector<8x8xi32>
    %22 = arith.cmpi ne, %20, %21 : vector<8x8xi32>
    %cst_15 = arith.constant -1.000000e+10 : f32
    %23 = vector.broadcast %cst_15 : f32 to vector<8x8xf32>
    %24 = arith.select %22, %23, %19 : vector<8x8xi1>, vector<8x8xf32>
    %cst_16 = arith.constant dense<0xFF800000> : vector<8xf32>
    %25 = vector.multi_reduction <maximumf>, %24, %cst_16 [1] : vector<8x8xf32> to vector<8xf32>
    %26 = vector.shape_cast %25 : vector<8xf32> to vector<8x1xf32>
    %27 = vector.broadcast %26 : vector<8x1xf32> to vector<8x8xf32>
    %28 = arith.subf %24, %27 : vector<8x8xf32>
    %29 = math.exp %28 : vector<8x8xf32>
    %cst_17 = arith.constant dense<0.000000e+00> : vector<8xf32>
    %30 = vector.multi_reduction <add>, %29, %cst_17 [1] : vector<8x8xf32> to vector<8xf32>
    %31 = vector.shape_cast %30 : vector<8xf32> to vector<8x1xf32>
    %32 = vector.broadcast %31 : vector<8x1xf32> to vector<8x8xf32>
    %33 = arith.divf %29, %32 : vector<8x8xf32>
    %c0_18 = arith.constant 0 : index
    %c0_19 = arith.constant 0 : index
    %34 = vector.load %arg17[%c0_18, %c0_19] : memref<8x16xf32, #tpu.memory_space<vmem>>, vector<8x8xf32>
    tpu.vector_store %arg17[%c0_18, %c0_19], %33 {strides = array<i32>} : memref<8x16xf32, #tpu.memory_space<vmem>>, vector<8x8xf32>,
    %35 = vector.shape_cast %33 : vector<8x8xf32> to vector<8x8x1xf32>
    %36 = vector.broadcast %35 : vector<8x8x1xf32> to vector<8x8x64xf32>
    %37 = arith.mulf %36, %13 : vector<8x8x64xf32>
    %cst_20 = arith.constant dense<0.000000e+00> : vector<8x64xf32>
    %38 = vector.multi_reduction <add>, %37, %cst_20 [1] : vector<8x8x64xf32> to vector<8x64xf32>
    %39 = vector.extract_strided_slice %3 {offsets = [0, 64], sizes = [8, 64], strides = [1, 1]} : vector<8x128xf32> to vector<8x64xf32>
    %40 = vector.extract_strided_slice %5 {offsets = [0, 64], sizes = [64, 64], strides = [1, 1]} : vector<64x128xf32> to vector<64x64xf32>
    %41 = vector.shape_cast %40 : vector<64x64xf32> to vector<8x8x64xf32>
    %42 = vector.extract_strided_slice %7 {offsets = [0, 64], sizes = [64, 64], strides = [1, 1]} : vector<64x128xf32> to vector<64x64xf32>
    %43 = vector.shape_cast %42 : vector<64x64xf32> to vector<8x8x64xf32>
    %44 = vector.shape_cast %39 : vector<8x64xf32> to vector<8x1x64xf32>
    %45 = vector.broadcast %44 : vector<8x1x64xf32> to vector<8x8x64xf32>
    %46 = arith.mulf %45, %41 : vector<8x8x64xf32>
    %cst_21 = arith.constant dense<0.000000e+00> : vector<8x8xf32>
    %47 = vector.multi_reduction <add>, %46, %cst_21 [2] : vector<8x8x64xf32> to vector<8x8xf32>
    %cst_22 = arith.constant 1.250000e-01 : f32
    %48 = vector.broadcast %cst_22 : f32 to vector<8x8xf32>
    %49 = arith.mulf %47, %48 : vector<8x8xf32>
    %50 = vector.extract_strided_slice %8 {offsets = [0, 8], sizes = [8, 8], strides = [1, 1]} : vector<8x16xi32> to vector<8x8xi32>
    %c0_i32_23 = arith.constant 0 : i32
    %51 = vector.broadcast %c0_i32_23 : i32 to vector<8x8xi32>
    %52 = arith.cmpi ne, %50, %51 : vector<8x8xi32>
    %cst_24 = arith.constant -1.000000e+10 : f32
    %53 = vector.broadcast %cst_24 : f32 to vector<8x8xf32>
    %54 = arith.select %52, %53, %49 : vector<8x8xi1>, vector<8x8xf32>
    %cst_25 = arith.constant dense<0xFF800000> : vector<8xf32>
    %55 = vector.multi_reduction <maximumf>, %54, %cst_25 [1] : vector<8x8xf32> to vector<8xf32>
    %56 = vector.shape_cast %55 : vector<8xf32> to vector<8x1xf32>
    %57 = vector.broadcast %56 : vector<8x1xf32> to vector<8x8xf32>
    %58 = arith.subf %54, %57 : vector<8x8xf32>
    %59 = math.exp %58 : vector<8x8xf32>
    %cst_26 = arith.constant dense<0.000000e+00> : vector<8xf32>
    %60 = vector.multi_reduction <add>, %59, %cst_26 [1] : vector<8x8xf32> to vector<8xf32>
    %61 = vector.shape_cast %60 : vector<8xf32> to vector<8x1xf32>
    %62 = vector.broadcast %61 : vector<8x1xf32> to vector<8x8xf32>
    %63 = arith.divf %59, %62 : vector<8x8xf32>
    %c0_27 = arith.constant 0 : index
    %c8 = arith.constant 8 : index
    %64 = vector.load %arg17[%c0_27, %c8] : memref<8x16xf32, #tpu.memory_space<vmem>>, vector<8x8xf32>
    tpu.vector_store %arg17[%c0_27, %c8], %63 {strides = array<i32>} : memref<8x16xf32, #tpu.memory_space<vmem>>, vector<8x8xf32>,
    %65 = vector.shape_cast %63 : vector<8x8xf32> to vector<8x8x1xf32>
    %66 = vector.broadcast %65 : vector<8x8x1xf32> to vector<8x8x64xf32>
    %67 = arith.mulf %66, %43 : vector<8x8x64xf32>
    %cst_28 = arith.constant dense<0.000000e+00> : vector<8x64xf32>
    %68 = vector.multi_reduction <add>, %67, %cst_28 [1] : vector<8x8x64xf32> to vector<8x64xf32>
    %69 = tpu.concatenate %38, %68 in 1 : vector<8x64xf32>, vector<8x64xf32> -> vector<8x128xf32>
    %c0_29 = arith.constant 0 : index
    %c0_30 = arith.constant 0 : index
    %70 = vector.load %arg7[%c0_29, %c0_30] : memref<128x128xf32, #tpu.memory_space<vmem>>, vector<128x128xf32>
    %cst_31 = arith.constant dense<0.000000e+00> : vector<8x128xf32>
    %71 = tpu.matmul %69, %70, %cst_31 {dimension_numbers = #tpu.dot_dimension_numbers<[1], [0], [0], [1], [0, 0, 1, 1], [], []>} : vector<8x128xf32>, vector<128x128xf32>, vector<8x128xf32> -> vector<8x128xf32>
    %c0_32 = arith.constant 0 : index
    %c0_33 = arith.constant 0 : index
    %72 = vector.load %arg8[%c0_32, %c0_33] : memref<1x128xf32, #tpu.memory_space<vmem>>, vector<1x128xf32>
    %73 = vector.broadcast %72 : vector<1x128xf32> to vector<8x128xf32>
    %74 = arith.addf %71, %73 : vector<8x128xf32>
    %75 = arith.addf %74, %0 : vector<8x128xf32>
    %cst_34 = arith.constant dense<0.000000e+00> : vector<8xf32>
    %76 = vector.multi_reduction <add>, %75, %cst_34 [1] : vector<8x128xf32> to vector<8xf32>
    %77 = vector.shape_cast %76 : vector<8xf32> to vector<8x1xf32>
    %cst_35 = arith.constant 1.280000e+02 : f32
    %78 = vector.broadcast %cst_35 : f32 to vector<8x1xf32>
    %79 = arith.divf %77, %78 : vector<8x1xf32>
    %80 = vector.broadcast %79 : vector<8x1xf32> to vector<8x128xf32>
    %81 = arith.subf %75, %80 : vector<8x128xf32>
    %82 = arith.mulf %81, %81 : vector<8x128xf32>
    %cst_36 = arith.constant dense<0.000000e+00> : vector<8xf32>
    %83 = vector.multi_reduction <add>, %82, %cst_36 [1] : vector<8x128xf32> to vector<8xf32>
    %84 = vector.shape_cast %83 : vector<8xf32> to vector<8x1xf32>
    %cst_37 = arith.constant 1.280000e+02 : f32
    %85 = vector.broadcast %cst_37 : f32 to vector<8x1xf32>
    %86 = arith.divf %84, %85 : vector<8x1xf32>
    %cst_38 = arith.constant 9.99999974E-6 : f32
    %87 = vector.broadcast %cst_38 : f32 to vector<8x1xf32>
    %88 = arith.addf %86, %87 : vector<8x1xf32>
    %89 = math.rsqrt %88 : vector<8x1xf32>
    %90 = vector.broadcast %89 : vector<8x1xf32> to vector<8x128xf32>
    %91 = arith.mulf %81, %90 : vector<8x128xf32>
    %c0_39 = arith.constant 0 : index
    %c0_40 = arith.constant 0 : index
    %92 = vector.load %arg9[%c0_39, %c0_40] : memref<1x128xf32, #tpu.memory_space<vmem>>, vector<1x128xf32>
    %93 = vector.broadcast %92 : vector<1x128xf32> to vector<8x128xf32>
    %94 = arith.mulf %91, %93 : vector<8x128xf32>
    %c0_41 = arith.constant 0 : index
    %c0_42 = arith.constant 0 : index
    %95 = vector.load %arg10[%c0_41, %c0_42] : memref<1x128xf32, #tpu.memory_space<vmem>>, vector<1x128xf32>
    %96 = vector.broadcast %95 : vector<1x128xf32> to vector<8x128xf32>
    %97 = arith.addf %94, %96 : vector<8x128xf32>
    %98 = vector.extract_strided_slice %0 {offsets = [0, 0], sizes = [8, 32], strides = [1, 1]} : vector<8x128xf32> to vector<8x32xf32>
    %c0_43 = arith.constant 0 : index
    %c0_44 = arith.constant 0 : index
    %99 = vector.load %arg11[%c0_43, %c0_44] : memref<128x32xf32, #tpu.memory_space<vmem>>, vector<128x32xf32>
    %cst_45 = arith.constant dense<0.000000e+00> : vector<8x32xf32>
    %100 = tpu.matmul %97, %99, %cst_45 {dimension_numbers = #tpu.dot_dimension_numbers<[1], [0], [0], [1], [0, 0, 1, 1], [], []>} : vector<8x128xf32>, vector<128x32xf32>, vector<8x32xf32> -> vector<8x32xf32>
    %c0_46 = arith.constant 0 : index
    %c0_47 = arith.constant 0 : index
    %101 = vector.load %arg12[%c0_46, %c0_47] : memref<32x32xf32, #tpu.memory_space<vmem>>, vector<32x32xf32>
    %cst_48 = arith.constant dense<0.000000e+00> : vector<8x32xf32>
    %102 = tpu.matmul %98, %101, %cst_48 {dimension_numbers = #tpu.dot_dimension_numbers<[1], [0], [0], [1], [0, 0, 1, 1], [], []>} : vector<8x32xf32>, vector<32x32xf32>, vector<8x32xf32> -> vector<8x32xf32>
    %103 = arith.addf %100, %102 : vector<8x32xf32>
    %c0_49 = arith.constant 0 : index
    %c0_50 = arith.constant 0 : index
    %104 = vector.load %arg13[%c0_49, %c0_50] : memref<1x32xf32, #tpu.memory_space<vmem>>, vector<1x32xf32>
    %105 = vector.broadcast %104 : vector<1x32xf32> to vector<8x32xf32>
    %106 = arith.addf %103, %105 : vector<8x32xf32>
    %cst_51 = arith.constant 0.000000e+00 : f32
    %107 = vector.broadcast %cst_51 : f32 to vector<8x32xf32>
    %108 = arith.maximumf %106, %107 : vector<8x32xf32>
    %c0_52 = arith.constant 0 : index
    %c0_53 = arith.constant 0 : index
    %109 = vector.load %arg14[%c0_52, %c0_53] : memref<32x32xf32, #tpu.memory_space<vmem>>, vector<32x32xf32>
    %cst_54 = arith.constant dense<0.000000e+00> : vector<8x32xf32>
    %110 = tpu.matmul %108, %109, %cst_54 {dimension_numbers = #tpu.dot_dimension_numbers<[1], [0], [0], [1], [0, 0, 1, 1], [], []>} : vector<8x32xf32>, vector<32x32xf32>, vector<8x32xf32> -> vector<8x32xf32>
    %c0_55 = arith.constant 0 : index
    %c0_56 = arith.constant 0 : index
    %111 = vector.load %arg15[%c0_55, %c0_56] : memref<1x32xf32, #tpu.memory_space<vmem>>, vector<1x32xf32>
    %112 = vector.broadcast %111 : vector<1x32xf32> to vector<8x32xf32>
    %113 = arith.addf %110, %112 : vector<8x32xf32>
    %c0_57 = arith.constant 0 : index
    %c0_58 = arith.constant 0 : index
    %114 = vector.load %arg16[%c0_57, %c0_58] : memref<8x32xf32, #tpu.memory_space<vmem>>, vector<8x32xf32>
    tpu.vector_store %arg16[%c0_57, %c0_58], %113 {strides = array<i32>} : memref<8x32xf32, #tpu.memory_space<vmem>>, vector<8x32xf32>,
    return
  }
  func.func @transform_0(%arg0: i32) -> (i32, i32) {
    %c0_i32 = arith.constant 0 : i32
    %c0_i32_0 = arith.constant 0 : i32
    return %arg0, %c0_i32 : i32, i32
  }
  func.func @transform_1(%arg0: i32) -> (i32, i32) {
    %c0_i32 = arith.constant 0 : i32
    %c0_i32_0 = arith.constant 0 : i32
    return %arg0, %c0_i32 : i32, i32
  }
  func.func @transform_2(%arg0: i32) -> (i32, i32) {
    %c0_i32 = arith.constant 0 : i32
    %c0_i32_0 = arith.constant 0 : i32
    return %arg0, %c0_i32 : i32, i32
  }
  func.func @transform_3(%arg0: i32) -> (i32, i32) {
    %c0_i32 = arith.constant 0 : i32
    %c0_i32_0 = arith.constant 0 : i32
    %c0_i32_1 = arith.constant 0 : i32
    return %c0_i32, %c0_i32_0 : i32, i32
  }
  func.func @transform_4(%arg0: i32) -> (i32, i32) {
    %c0_i32 = arith.constant 0 : i32
    %c0_i32_0 = arith.constant 0 : i32
    %c0_i32_1 = arith.constant 0 : i32
    return %c0_i32, %c0_i32_0 : i32, i32
  }
  func.func @transform_5(%arg0: i32) -> (i32, i32) {
    %c0_i32 = arith.constant 0 : i32
    %c0_i32_0 = arith.constant 0 : i32
    %c0_i32_1 = arith.constant 0 : i32
    return %c0_i32, %c0_i32_0 : i32, i32
  }
  func.func @transform_6(%arg0: i32) -> (i32, i32) {
    %c0_i32 = arith.constant 0 : i32
    %c0_i32_0 = arith.constant 0 : i32
    %c0_i32_1 = arith.constant 0 : i32
    return %c0_i32, %c0_i32_0 : i32, i32
  }
  func.func @transform_7(%arg0: i32) -> (i32, i32) {
    %c0_i32 = arith.constant 0 : i32
    %c0_i32_0 = arith.constant 0 : i32
    %c0_i32_1 = arith.constant 0 : i32
    return %c0_i32, %c0_i32_0 : i32, i32
  }
  func.func @transform_8(%arg0: i32) -> (i32, i32) {
    %c0_i32 = arith.constant 0 : i32
    %c0_i32_0 = arith.constant 0 : i32
    %c0_i32_1 = arith.constant 0 : i32
    return %c0_i32, %c0_i32_0 : i32, i32
  }
  func.func @transform_9(%arg0: i32) -> (i32, i32) {
    %c0_i32 = arith.constant 0 : i32
    %c0_i32_0 = arith.constant 0 : i32
    %c0_i32_1 = arith.constant 0 : i32
    return %c0_i32, %c0_i32_0 : i32, i32
  }
  func.func @transform_10(%arg0: i32) -> (i32, i32) {
    %c0_i32 = arith.constant 0 : i32
    %c0_i32_0 = arith.constant 0 : i32
    %c0_i32_1 = arith.constant 0 : i32
    return %c0_i32, %c0_i32_0 : i32, i32
  }
  func.func @transform_11(%arg0: i32) -> (i32, i32) {
    %c0_i32 = arith.constant 0 : i32
    %c0_i32_0 = arith.constant 0 : i32
    %c0_i32_1 = arith.constant 0 : i32
    return %c0_i32, %c0_i32_0 : i32, i32
  }
  func.func @transform_12(%arg0: i32) -> (i32, i32) {
    %c0_i32 = arith.constant 0 : i32
    %c0_i32_0 = arith.constant 0 : i32
    %c0_i32_1 = arith.constant 0 : i32
    return %c0_i32, %c0_i32_0 : i32, i32
  }
  func.func @transform_13(%arg0: i32) -> (i32, i32) {
    %c0_i32 = arith.constant 0 : i32
    %c0_i32_0 = arith.constant 0 : i32
    %c0_i32_1 = arith.constant 0 : i32
    return %c0_i32, %c0_i32_0 : i32, i32
  }
  func.func @transform_14(%arg0: i32) -> (i32, i32) {
    %c0_i32 = arith.constant 0 : i32
    %c0_i32_0 = arith.constant 0 : i32
    %c0_i32_1 = arith.constant 0 : i32
    return %c0_i32, %c0_i32_0 : i32, i32
  }
  func.func @transform_15(%arg0: i32) -> (i32, i32) {
    %c0_i32 = arith.constant 0 : i32
    %c0_i32_0 = arith.constant 0 : i32
    return %arg0, %c0_i32 : i32, i32
  }
  func.func @transform_16(%arg0: i32) -> (i32, i32) {
    %c0_i32 = arith.constant 0 : i32
    %c0_i32_0 = arith.constant 0 : i32
    return %arg0, %c0_i32 : i32, i32
  }
}

</mosaic_0001>

<bundles_post_ra>
// kernel: tpu_custom_call.1
= control target key start
LH: loop header
LB: loop body
LE: loop exit
PB: predicated region body
PF: predicated region fallthrough
CT: control target
= control target key end

     0   :  { %s3975_s0 = inlined_call_operand.hbm [shape: f32[16,128], index: 0, kind: input, shape index: {}]   ;;  %s3976_s1 = inlined_call_operand.vmem [shape: f32[128,128], index: 1, kind: input, shape index: {}]   ;;  %s3977_s2 = inlined_call_operand.hbm [shape: s32[16,16], index: 2, kind: input, shape index: {}]   ;;  %s3978_s3 = inlined_call_operand.hbm [shape: f32[128,128], index: 3, kind: input, shape index: {}]   ;;  %s3979_s4 = inlined_call_operand.hbm [shape: f32[128,128], index: 4, kind: input, shape index: {}]   ;;  %s3980_s5 = inlined_call_operand.hbm [shape: f32[128,128], index: 5, kind: input, shape index: {}]   ;;  %s3981_s6 = inlined_call_operand.hbm [shape: f32[128,128], index: 6, kind: input, shape index: {}]   ;;  %s3982_s7 = inlined_call_operand.vmem [shape: f32[1,128], index: 7, kind: input, shape index: {}]   ;;  %s3983_s8 = inlined_call_operand.vmem [shape: f32[1,128], index: 8, kind: input, shape index: {}]   ;;  %s3984_s9 = inlined_call_operand.vmem [shape: f32[1,128], index: 9, kind: input, shape index: {}]   ;;  %s3985_s10 = inlined_call_operand.vmem [shape: f32[128,32], index: 10, kind: input, shape index: {}]   ;;  %s3986_s11 = inlined_call_operand.vmem [shape: f32[32,32], index: 11, kind: input, shape index: {}]   ;;  %s3987_s12 = inlined_call_operand.vmem [shape: f32[1,32], index: 12, kind: input, shape index: {}]   ;;  %s3988_s13 = inlined_call_operand.hbm [shape: f32[32,32], index: 13, kind: input, shape index: {}]   ;;  %s3989_s14 = inlined_call_operand.vmem [shape: f32[1,32], index: 14, kind: input, shape index: {}]   ;;  %s3990_s15 = inlined_call_operand.hbm [shape: f32[16,32], index: 15, kind: output, shape index: {0}]   ;;  %s3991_s16 = inlined_call_operand.hbm [shape: f32[16,16], index: 16, kind: output, shape index: {1}]  }
   0x1   :  { %4000 = sst [smem:[#allocation25_spill]] %s3975_s0 }
   0x2   :  { %4001 = sst [smem:[#allocation26_spill]] %s3978_s3 }
   0x3   :  { %4002 = sst [smem:[#allocation27_spill]] %s3979_s4 }
   0x4   :  { %4003 = sst [smem:[#allocation28_spill]] %s3980_s5 }
   0x5   :  { %4004 = sst [smem:[#allocation29_spill]] %s3981_s6 }
   0x6   :  { %4005 = sst [smem:[#allocation30_spill]] %s3983_s8 }
   0x7   :  { %4006 = sst [smem:[#allocation31_spill]] %s3984_s9 }
   0x8   :  { %4007 = sst [smem:[#allocation32_spill]] %s3986_s11 }
   0x9   :  { %4008 = sst [smem:[#allocation33_spill]] %s3987_s12 }
   0xa   :  { %4009 = sst [smem:[#allocation34_spill]] %s3988_s13 }
   0xb   :  { %4010 = sst [smem:[#allocation35_spill]] %s3989_s14 }
   0xc   :  { %4011 = sst [smem:[#allocation36_spill]] %s3990_s15 }
   0xd   :  { %4012 = sst [smem:[#allocation37_spill]] %s3991_s16 }
   0xe   :  { %22 = vsyncpa [#allocation3], 0 }
   0xf   :  { %24 = vsyncpa [#allocation3 + $0x1], 0 }
  0x10   :  { %25 = vsyncpa [#allocation6], 0 }
  0x11   :  { %27 = vsyncpa [#allocation6 + $0x1], 0 }
  0x12   :  { %28 = vsyncpa [#allocation9], 0 }
  0x13   :  { %29 = vsyncpa [#allocation12], 0 }
  0x14   :  { %30 = vsyncpa [#allocation4], 0 }
  0x15   :  { %32 = vsyncpa [#allocation4 + $0x1], 0 }
  0x16   :  { %33 = vsyncpa [#allocation16], 0 }
  0x17   :  { %35 = vsyncpa [#allocation16 + $0x1], 0  ;;  %s3282_s21 = smov 0   ;;  %s3284_s22 = smov 0  }
  0x18   :  { %s3286_s23 = smov 0   ;;  %s3288_s24 = smov 0  }
  0x19 LB: > { %s3180_s25 = smov [#allocation7]   ;;  %s3303_s27 = sadd.s32 4294967295, %s3178_s24   ;;  %s3178_s24 = sphi %s3288_s24, %s4050_s24   ;;  %s3174_s23 = sphi %s3286_s23, %s4049_s23   ;;  %s3170_s22 = sphi %s3284_s22, %s4048_s22   ;;  %s3166_s21 = sphi %s3282_s21, %s4047_s21  }
  0x1a   : > { %s440_s26 = sshll.u32 %s3180_s25, 4  ;;  %p2230_p0 = scmp.ge.s32.totalorder %s3178_s24, 1  ;;  %s3308_s26 = int_to_ptr.vmem [resolvable:$true] %s440_s26 }
  0x1b   : > { %p3996_p1 = scmp.eq.s32.totalorder %s3303_s27, 0  ;;  %p428_p2 = scmp.lt.s32.totalorder %s3178_s24, 3 }
  0x1c   : > { %s3181_s29 = smov [#allocation8]   ;;  %s3182_s17 = smov [#allocation11]  }
  0x1d   : > { %p3310_p3 = pnand %p2230_p0, %p428_p2  ;;  %s453_s30 = sshll.u32 %s3181_s29, 4  ;;  %s3323_s30 = int_to_ptr.vmem [resolvable:$true] %s453_s30 }
  0x1e   : > { %s479_s18 = sshll.u32 %s3182_s17, 4  ;;  %s4015_s3 = sld [smem:[#allocation26_spill]]  ;;  %s3325_s18 = int_to_ptr.vmem [resolvable:$true] %s479_s18 }
  0x1f   : > { %s4013_s28 = scalar_select %p3310_p3, 1, 0 }
  0x20   : > { %p2766_p5 = pneg %p3310_p3 }
  0x22   : > { %p3319_p6 = pnand %p2766_p5, %p3996_p1 }
  0x24   : > { %s2864_s25 = scalar_lea.hbm %s4015_s3, 2048  ;;  %p3335_p8 = pneg %p3319_p6 }
  0x25   : > { %p2865_p7 = scmp.ne.s32.totalorder %s4015_s3, %s2864_s25  ;;  %p2871_p11 = scmp.lt.u32.totalorder %s2864_s25, %s4015_s3 }
  0x27   : > { %p2867_p9 = pnand %p3335_p8, %p2865_p7 }
  0x29   : > { %p2868_p10 = pneg %p2867_p9 }
  0x2b   : > { %p2873_p12 = pnand %p2871_p11, %p2868_p10 }
  0x2d   : > { %2876 = shalt.err (!%p2873_p12)
}
  0x2e   : > { %s2877_s14 = scalar_lea.vmem %s3308_s26, 2048  ;;  %p2885_p5 = scmp.lt.s32.totalorder %s3308_s26, %s3308_s26 }
  0x2f   : > { %p2878_p13 = scmp.ne.s32.totalorder %s3308_s26, %s2877_s14  ;;  %p2886_p4 = scmp.lt.s32.totalorder %s2877_s14, %s2877_s14 }
  0x31   : > { %p2880_p0 = pnand %p2878_p13, %p3335_p8  ;;  %p2887_p7 = por %p2886_p4, %p2885_p5 }
  0x33   : > { %p2881_p2 = pneg %p2880_p0 }
  0x35   : > { %p2888_p9 = pnand %p2887_p7, %p2881_p2 }
  0x37   : > { %2891 = shalt.err (!%p2888_p9)
}
  0x38   : > { %s3183_s15 = smov 128   ;;  %s3184_s16 = smov 8  }
  0x39   : > { %2769 = dma.hbm_to_vmem [thread:$0]  (!%p3319_p6), %s4015_s3, 2048, %s3308_s26, [#allocation6], %s3183_s15, %s3183_s15, %s3184_s16  }
  0x3a   : > { %s4017_s4 = sld [smem:[#allocation27_spill]] }
  0x40   : > { %s2892_s14 = scalar_lea.hbm %s4017_s4, 2048 }
  0x41   : > { %p2893_p4 = scmp.ne.s32.totalorder %s4017_s4, %s2892_s14  ;;  %p2899_p12 = scmp.lt.u32.totalorder %s2892_s14, %s4017_s4 }
  0x43   : > { %p2895_p10 = pnand %p2893_p4, %p3335_p8 }
  0x45   : > { %p2896_p11 = pneg %p2895_p10 }
  0x47   : > { %p2901_p13 = pnand %p2899_p12, %p2896_p11 }
  0x49   : > { %2904 = shalt.err (!%p2901_p13)
}
  0x4a   : > { %s2905_s26 = scalar_lea.vmem %s3323_s30, 2048  ;;  %p2913_p7 = scmp.lt.s32.totalorder %s3323_s30, %s3323_s30 }
  0x4b   : > { %p2906_p0 = scmp.ne.s32.totalorder %s3323_s30, %s2905_s26  ;;  %p2914_p9 = scmp.lt.s32.totalorder %s2905_s26, %s2905_s26 }
  0x4d   : > { %p2908_p2 = pnand %p2906_p0, %p3335_p8  ;;  %p2915_p4 = por %p2914_p9, %p2913_p7 }
  0x4f   : > { %p2909_p5 = pneg %p2908_p2 }
  0x51   : > { %p2916_p10 = pnand %p2915_p4, %p2909_p5 }
  0x53   : > { %2919 = shalt.err (!%p2916_p10)
}
  0x54   : > { %2772 = dma.hbm_to_vmem [thread:$0]  (!%p3319_p6), %s4017_s4, 2048, %s3323_s30, [#allocation9], %s3183_s15, %s3183_s15, %s3184_s16  }
  0x55   : > { %s4018_s6 = sld [smem:[#allocation29_spill]] }
  0x5b   : > { %s2920_s19 = scalar_lea.hbm %s4018_s6, 2048 }
  0x5c   : > { %p2921_p11 = scmp.ne.s32.totalorder %s4018_s6, %s2920_s19  ;;  %p2927_p0 = scmp.lt.u32.totalorder %s2920_s19, %s4018_s6 }
  0x5e   : > { %p2923_p12 = pnand %p2921_p11, %p3335_p8 }
  0x60   : > { %p2924_p13 = pneg %p2923_p12 }
  0x62   : > { %p2929_p2 = pnand %p2927_p0, %p2924_p13 }
  0x64   : > { %2932 = shalt.err (!%p2929_p2)
}
  0x65   : > { %s2933_s30 = scalar_lea.vmem %s3325_s18, 2048  ;;  %p2941_p4 = scmp.lt.s32.totalorder %s3325_s18, %s3325_s18 }
  0x66   : > { %p2934_p5 = scmp.ne.s32.totalorder %s3325_s18, %s2933_s30  ;;  %p2942_p10 = scmp.lt.s32.totalorder %s2933_s30, %s2933_s30 }
  0x68   : > { %p2936_p7 = pnand %p2934_p5, %p3335_p8  ;;  %p2943_p11 = por %p2942_p10, %p2941_p4 }
  0x6a   : > { %p2937_p9 = pneg %p2936_p7 }
  0x6c   : > { %p2944_p12 = pnand %p2943_p11, %p2937_p9 }
  0x6e   : > { %2947 = shalt.err (!%p2944_p12)
}
  0x6f   : > { %2778 = dma.hbm_to_vmem [thread:$0]  (!%p3319_p6), %s4018_s6, 2048, %s3325_s18, [#allocation12], %s3183_s15, %s3183_s15, %s3184_s16  }
  0x70   : > { %s3185_s9 = smov [#allocation10]   ;;  %s3186_s12 = smov [#allocation13]  }
  0x71   : > { %s466_s11 = sshll.u32 %s3185_s9, 4  ;;  %s510_s19 = sshll.u32 %s3186_s12, 4  ;;  %s467_s11 = int_to_ptr.vmem [resolvable:$true] %s466_s11  ;;  %s511_s19 = int_to_ptr.vmem [resolvable:$true] %s510_s19 }
  0x72   : > { %s4019_s5 = sld [smem:[#allocation28_spill]] }
  0x78   : > { %s2948_s17 = scalar_lea.hbm %s4019_s5, 2048 }
  0x79   : > { %p2949_p13 = scmp.ne.s32.totalorder %s4019_s5, %s2948_s17  ;;  %p2955_p5 = scmp.lt.u32.totalorder %s2948_s17, %s4019_s5 }
  0x7b   : > { %p2951_p0 = pnand %p2949_p13, %p3335_p8 }
  0x7d   : > { %p2952_p2 = pneg %p2951_p0 }
  0x7f   : > { %p2957_p7 = pnand %p2955_p5, %p2952_p2 }
  0x81   : > { %2960 = shalt.err (!%p2957_p7)
}
  0x82   : > { %s2961_s18 = scalar_lea.vmem %s467_s11, 2048  ;;  %p2969_p11 = scmp.lt.s32.totalorder %s467_s11, %s467_s11 }
  0x83   : > { %p2962_p9 = scmp.ne.s32.totalorder %s467_s11, %s2961_s18  ;;  %p2970_p12 = scmp.lt.s32.totalorder %s2961_s18, %s2961_s18 }
  0x85   : > { %p2964_p4 = pnand %p2962_p9, %p3335_p8  ;;  %p2971_p1 = por %p2970_p12, %p2969_p11 }
  0x87   : > { %p2965_p10 = pneg %p2964_p4 }
  0x89   : > { %p2972_p3 = pnand %p2971_p1, %p2965_p10 }
  0x8b   : > { %2975 = shalt.err (!%p2972_p3)
}
  0x8c   : > { %2775 = dma.hbm_to_vmem [thread:$0]  (!%p3319_p6), %s4019_s5, 2048, %s467_s11, [#allocation9], %s3183_s15, %s3183_s15, %s3184_s16  }
  0x8d   : > { %s4020_s13 = sld [smem:[#allocation34_spill]] }
  0x93   : > { %s2976_s20 = scalar_lea.hbm %s4020_s13, 512 }
  0x94   : > { %p2977_p1 = scmp.ne.s32.totalorder %s4020_s13, %s2976_s20  ;;  %p2983_p0 = scmp.lt.u32.totalorder %s2976_s20, %s4020_s13 }
  0x96   : > { %p2979_p3 = pnand %p2977_p1, %p3335_p8 }
  0x98   : > { %p2980_p13 = pneg %p2979_p3 }
  0x9a   : > { %p2985_p2 = pnand %p2983_p0, %p2980_p13 }
  0x9c   : > { %2988 = shalt.err (!%p2985_p2)
}
  0x9d   : > { %s2989_s26 = scalar_lea.vmem %s511_s19, 512  ;;  %p2997_p4 = scmp.lt.s32.totalorder %s511_s19, %s511_s19 }
  0x9e   : > { %p2990_p5 = scmp.ne.s32.totalorder %s511_s19, %s2989_s26  ;;  %p2998_p10 = scmp.lt.s32.totalorder %s2989_s26, %s2989_s26 }
  0xa0   : > { %p2992_p7 = pnand %p2990_p5, %p3335_p8  ;;  %p2999_p11 = por %p2998_p10, %p2997_p4 }
  0xa2   : > { %p2993_p9 = pneg %p2992_p7 }
  0xa4   : > { %p3000_p12 = pnand %p2999_p11, %p2993_p9 }
  0xa6   : > { %3003 = shalt.err (!%p3000_p12)
}
  0xa7   : > { %2781 = dma.hbm_to_vmem [thread:$0]  (!%p3319_p6), %s4020_s13, 512, %s511_s19, [#allocation12], %s3183_s15, %s3183_s15, %s3184_s16  }
  0xa8   : > { %s2229_s0 = sadd.s32 4294967294, %s3178_s24   ;;  %s3455_s29 = sadd.s32 1, %s3178_s24  }
  0xa9   : > { %s48_s3 = sadd.s32 1, %s3174_s23  ;;  %s45_s8 = ssub.s32 %s3178_s24, %s3455_s29 }
  0xaa   : > { %p55_p8 = scmp.ne.s32.totalorder %s3174_s23, %s3170_s22  ;;  %p46_p1 = scmp.eq.s32.totalorder %s45_s8, 0 }
  0xab   : > { %p56_p3 = scmp.eq.s32.totalorder %s3178_s24, 0  ;;  %p61_p13 = scmp.ne.s32.totalorder %s3170_s22, %s3166_s21 }
  0xac   : > { %p389_p0 = scmp.eq.s32.totalorder %s3303_s27, 1  ;;  %p4022_p5 = scmp.eq.s32.totalorder %s3303_s27, 0 }
  0xad   : > { %s3467_s9 = scalar_select %p46_p1, %s3174_s23, %s48_s3  }
  0xae   : > { %p57_p2 = por %p56_p3, %p55_p8  ;;  %p3471_p7 = por %p4022_p5, %p61_p13 }
  0xaf   : > { %4021 = sst [smem:[#allocation24_spill]] %s3467_s9  ;;  %p3475_p6 = por %p389_p0, %p55_p8 }
  0xb0   : > { %s4023_s12 = scalar_select %p3471_p7, 1, 0 }
  0xb1   : > { %s4024_s15 = scalar_select %p3475_p6, 1, 0 }
  0xb2   : > { %p395_p9 = scmp.eq.s32.totalorder %s2229_s0, 1  ;;  %p2801_p4 = scmp.lt.s32.totalorder %s3178_s24, 2 }
  0xb3   : > { %s527_s16 = sand.u32 1, %s3174_s23   ;;  %s2238_s25 = sshll.u32 %s3178_s24, 7 }
  0xb4   : > { %p3481_p10 = por %p395_p9, %p61_p13  ;;  %s3485_s20 = sshll.u32 %s527_s16, 3 }
  0xb5   : > { %s4026_s30 = sld [smem:[#allocation25_spill]]  ;;  %s531_s11 = scalar_lea.vmem [#allocation2], %s3485_s20 }
  0xb6   : > { %s4025_s19 = scalar_select %p3481_p10, 1, 0 }
  0xb7   : > { %s538_s18 = sshll.u32 %s531_s11, 4  ;;  %p3494_p11 = pnand %p2801_p4, %p57_p2  ;;  %s3498_s18 = int_to_ptr.vmem [resolvable:$true] %s538_s18 }
  0xb8   : > { %s3503_s17 = scalar_lea.hbm %s3977_s2, %s2238_s25  ;;  %s528_s14 = scalar_lea.sflag [#allocation3], %s527_s16 }
  0xb9   : > { %p3006_p8 = pneg %p3494_p11 }
  0xbb   : > { %s3491_s26 = scalar_lea.hbm %s4026_s30, %s2238_s25  ;;  %s3009_s6 = scalar_lea.hbm %s4026_s30, 256 }
  0xbc   : > { %s3004_s4 = scalar_lea.hbm %s3491_s26, 128  ;;  %p3010_p13 = scmp.lt.u32.totalorder %s3491_s26, %s4026_s30 }
  0xbd   : > { %p3005_p12 = scmp.ne.s32.totalorder %s3491_s26, %s3004_s4  ;;  %p3011_p0 = scmp.lt.u32.totalorder %s3009_s6, %s3004_s4 }
  0xbe   : > { %p3013_p5 = scmp.lt.u32.totalorder %s3004_s4, %s3491_s26 }
  0xbf   : > { %p3007_p1 = pnand %p3006_p8, %p3005_p12  ;;  %p3012_p2 = por %p3011_p0, %p3010_p13 }
  0xc1   : > { %p3008_p3 = pneg %p3007_p1  ;;  %p3014_p9 = por %p3013_p5, %p3012_p2 }
  0xc3   : > { %p3015_p4 = pnand %p3014_p9, %p3008_p3 }
  0xc5   : > { %3018 = shalt.err (!%p3015_p4)
}
  0xc6   : > { %s3019_s16 = scalar_lea.vmem %s3498_s18, 128  ;;  %s3187_s5 = smov [#allocation2]  }
  0xc7   : > { %p3020_p12 = scmp.ne.s32.totalorder %s3498_s18, %s3019_s16  ;;  %s3024_s25 = sshll.u32 %s3187_s5, 4  ;;  %s3025_s25 = int_to_ptr.vmem [resolvable:$false] %s3024_s25 }
  0xc8   : > { %s3026_s13 = scalar_lea.vmem %s3025_s25, 256  ;;  %p3027_p6 = scmp.lt.s32.totalorder %s3498_s18, %s3025_s25 }
  0xc9   : > { %p3022_p1 = pnand %p3020_p12, %p3006_p8  ;;  %p3028_p13 = scmp.lt.s32.totalorder %s3026_s13, %s3019_s16 }
  0xcb   : > { %p3023_p10 = pneg %p3022_p1  ;;  %p3029_p0 = por %p3028_p13, %p3027_p6 }
  0xcd   : > { %p3030_p2 = pnand %p3029_p0, %p3023_p10 }
  0xcf   : > { %3033 = shalt.err (!%p3030_p2)
}
  0xd0   : > { %2785 = dma.hbm_to_vmem [thread:$0]  (!%p3494_p11), %s3491_s26, 128, %s3498_s18, %s528_s14  }
  0xd1   : > { %s554_s4 = sand.u32 1, %s3178_s24   ;;  %s558_s6 = scalar_lea.vmem [#allocation5], %s3485_s20 }
  0xd2   : > { %s565_s9 = sshll.u32 %s558_s6, 4  ;;  %s555_s3 = scalar_lea.sflag [#allocation6], %s554_s4  ;;  %s566_s9 = int_to_ptr.vmem [resolvable:$true] %s565_s9 }
  0xd3   : > { %s3034_s8 = scalar_lea.hbm %s3503_s17, 128  ;;  %s3039_s5 = scalar_lea.hbm %s3977_s2, 256 }
  0xd4   : > { %p3035_p6 = scmp.ne.s32.totalorder %s3503_s17, %s3034_s8  ;;  %p3040_p5 = scmp.lt.u32.totalorder %s3503_s17, %s3977_s2 }
  0xd5   : > { %p3041_p9 = scmp.lt.u32.totalorder %s3039_s5, %s3034_s8  ;;  %p3043_p12 = scmp.lt.u32.totalorder %s3034_s8, %s3503_s17 }
  0xd6   : > { %p3037_p10 = pnand %p3035_p6, %p3006_p8 }
  0xd7   : > { %p3042_p4 = por %p3041_p9, %p3040_p5 }
  0xd8   : > { %p3038_p3 = pneg %p3037_p10 }
  0xd9   : > { %p3044_p1 = por %p3043_p12, %p3042_p4 }
  0xdb   : > { %p3045_p13 = pnand %p3044_p1, %p3038_p3 }
  0xdd   : > { %3048 = shalt.err (!%p3045_p13)
}
  0xde   : > { %s3049_s20 = scalar_lea.vmem %s566_s9, 128  ;;  %s3188_s26 = smov [#allocation5]  }
  0xdf   : > { %p3050_p0 = scmp.ne.s32.totalorder %s566_s9, %s3049_s20  ;;  %s3054_s18 = sshll.u32 %s3188_s26, 4  ;;  %s3055_s18 = int_to_ptr.vmem [resolvable:$false] %s3054_s18 }
  0xe0   : > { %s3056_s14 = scalar_lea.vmem %s3055_s18, 256  ;;  %p3057_p10 = scmp.lt.s32.totalorder %s566_s9, %s3055_s18 }
  0xe1   : > { %p3052_p2 = pnand %p3050_p0, %p3006_p8  ;;  %p3058_p7 = scmp.lt.s32.totalorder %s3056_s14, %s3049_s20 }
  0xe3   : > { %p3053_p6 = pneg %p3052_p2  ;;  %p3059_p5 = por %p3058_p7, %p3057_p10 }
  0xe5   : > { %p3060_p9 = pnand %p3059_p5, %p3053_p6 }
  0xe7   : > { %3063 = shalt.err (!%p3060_p9)
}
  0xe8   : > { %2788 = dma.hbm_to_vmem [thread:$0]  (!%p3494_p11), %s3503_s17, 128, %s566_s9, %s555_s3  }
  0xe9   : > { %p4028_p3 = scmp.ne.s32.totalorder %s4013_s28, 0 }
  0xea   : > { %s3554_s4 = sand.u32 (!%p4028_p3), 1, %s3170_s22   ;;  %p4029_p7 = scmp.ne.s32.totalorder (!%p4028_p3), %s4023_s12, 0 }
  0xeb   : > { %574 = sbr.rel (%p4028_p3) target bundleno = 2346 (0x92a), region = 80  ;;  %s3557_s6 = sshll.u32 (!%p4028_p3), %s3554_s4, 3 }
  0xec   : > { %s577_s8 = scalar_lea.sflag (!%p4028_p3), [#allocation3], %s3554_s4  ;;  %s580_s11 = scalar_lea.vmem (!%p4028_p3), [#allocation2], %s3557_s6 }
  0xf2   : > { %3137 = dma.done.wait (%p4029_p7), %s577_s8, 128  }
  0xf3   : > { %3139 = vsyncadd (%p4029_p7), %s577_s8, 4294967168  ;;  %s585_s28 = sand.u32 1, %s3303_s27   ;;  %s589_s17 = scalar_lea.vmem [#allocation5], %s3557_s6 }
  0xf4   : > { %s586_s0 = scalar_lea.sflag [#allocation6], %s585_s28 }
  0xf5   : > { %3141 = dma.done.wait (%p4029_p7), %s586_s0, 128  }
  0xf6   : > { %3143 = vsyncadd (%p4029_p7), %s586_s0, 4294967168  ;;  %p4030_p11 = scmp.eq.s32.totalorder %s3303_s27, 0 }
  0xf8   : > { %3145 = dma.done.wait (%p4030_p11), [#allocation6], 2048   ;;  %p4031_p8 = pmov %p4030_p11 }
  0xfa   : > { %3147 = vsyncadd (%p4031_p8), [#allocation6], 4294965248  ;;  %p4032_p4 = pmov %p4031_p8 }
  0xfc   : > { %3149 = dma.done.wait (%p4032_p4), [#allocation9], 4096   ;;  %p4033_p12 = pmov %p4032_p4 }
  0xfd   : > { %p4034_p1 = pmov %p4032_p4 }
  0xfe   : > { %3151 = vsyncadd (%p4033_p12), [#allocation9], 4294963200 }
  0xff   : > { %3153 = dma.done.wait (%p4034_p1), [#allocation12], 2560   ;;  %p4035_p13 = pmov %p4034_p1 }
 0x100   : > { %v3189_v0 = vmov 0.0|0.0   ;;  %vm3190_vm0 = vmmov 0   ;;  %v3191_v1 = vmov 0.0   ;;  %s2251_s12 = sshll.u32 %s3303_s27, 3  ;;  %v688_v2 = vld [vmem:[#allocation7] sm:$0xff]  ;;  %v689_v3 = vld [vmem:[#allocation7 + $0x8] sm:$0xff]  ;;  %v1022_v61 = vlaneseq }
 0x101   : > { %3155 = vsyncadd (%p4035_p13), [#allocation12], 4294964736  ;;  %2590 = vmatprep.subr.bf16.mxu0 %v3189_v0  ;;  %2407 = vmatprep.mubr.msk.f32.mxu0 %vm3190_vm0, %v3191_v1  ;;  %p674_p0 = scmp.lt.s32.totalorder %s2251_s12, 15  ;;  %v774_v4 = vld [vmem:[#allocation8] sm:$0xff]  ;;  %v2591_v5 = vpack.c.bf16 %v689_v3, %v688_v2  ;;  %v775_v6 = vld [vmem:[#allocation8 + $0x8] sm:$0xff]  ;;  %s3193_s25 = smov 64  }
 0x102   : > { %v690_v7 = vld [vmem:[#allocation7 + $0x10] sm:$0xff]  ;;  %v691_v8 = vld [vmem:[#allocation7 + $0x18] sm:$0xff]  ;;  %v2614_v9 = vpack.c.bf16 %v775_v6, %v774_v4  ;;  %v778_v14 = vld [vmem:[#allocation8 + $0x20] sm:$0xff]  ;;  %v3192_v59 = vmov 1966171168   ;;  %v3634_v63 = vshrl.u32 %v1022_v61, 7 }
 0x103   : > { %s4052_s12 = smov (!%p674_p0, %s2251_s12), 15  ;;  %v776_v10 = vld [vmem:[#allocation8 + $0x10] sm:$0xff]  ;;  %v777_v11 = vld [vmem:[#allocation8 + $0x18] sm:$0xff]  ;;  %2592 = vmatpush3.bf16.msra.mxu0 %v2591_v5  ;;  %v2594_v12 = vpack.c.bf16 %v691_v8, %v690_v7  ;;  %v779_v15 = vld [vmem:[#allocation8 + $0x28] sm:$0xff]  ;;  %v1020_v60 = vunpack.c.l.s4 %v3192_v59  ;;  %vm1115_vm1 = vcmask 523264   ;;  %vm1191_vm2 = vcmask 1041409  }
 0x104   : > { %v2618_v13 = vpack.c.bf16 %v777_v11, %v776_v10  ;;  %2615 = vmatprep.subr.bf16.mxu1 %v2614_v9  ;;  %2593 = vmatprep.subr.bf16.mxu0 %v3189_v0  ;;  %v692_v16 = vld [vmem:[#allocation7 + $0x20] sm:$0xff]  ;;  %v693_v17 = vld [vmem:[#allocation7 + $0x28] sm:$0xff]  ;;  %s2252_s9 = sshll.u32 %s4052_s12, 3  ;;  %v2622_v18 = vpack.c.bf16 %v779_v15, %v778_v14  ;;  %v780_v20 = vld [vmem:[#allocation8 + $0x30] sm:$0xff]  ;;  %v3638_v7 = vsub.s32 0, %v3634_v63  ;;  %vm1193_vm3 = vcmask 1042434  }
 0x105   : > { %2617 = vmatpush3.bf16.msra.mxu1 %v2614_v9  ;;  %v2597_v19 = vpack.c.bf16 %v693_v17, %v692_v16  ;;  %v781_v21 = vld [vmem:[#allocation8 + $0x38] sm:$0xff]  ;;  %v694_v22 = vld [vmem:[#allocation7 + $0x30] sm:$0xff]  ;;  %s3592_s5 = scalar_lea.vmem %s3976_s1, %s2252_s9  ;;  %v782_v26 = vld [vmem:[#allocation8 + $0x40] sm:$0xff]  ;;  %v1021_v62 = vunpack.c.0.s8 %v1020_v60  ;;  %vm1195_vm4 = vcmask 1043459   ;;  %vm1197_vm5 = vcmask 1044484   ;;  %s3194_s13 = smov 120  }
 0x106   : > { %2619 = vmatprep.subr.bf16.mxu1 %v2618_v13  ;;  %v695_v23 = vld [vmem:[#allocation7 + $0x38] sm:$0xff]  ;;  %v2626_v24 = vpack.c.bf16 %v781_v21, %v780_v20  ;;  %v783_v27 = vld [vmem:[#allocation8 + $0x48] sm:$0xff]  ;;  %v680_v28 = vld [vmem:[%s3592_s5] sm:$0xff]  ;;  %vm1199_vm6 = vcmask 1045509   ;;  %vm1201_vm7 = vcmask 1046534   ;;  %vm1203_vm8 = vcmask 1047559  }
 0x107   : > { %2595 = vmatpush3.bf16.msra.mxu0 %v2594_v12  ;;  %v2600_v25 = vpack.c.bf16 %v695_v23, %v694_v22  ;;  %v696_v29 = vld [vmem:[#allocation7 + $0x40] sm:$0xff]  ;;  %v697_v30 = vld [vmem:[#allocation7 + $0x48] sm:$0xff]  ;;  %2442 = vmatprep.mubr.f32.mxu1 %v680_v28  ;;  %v2630_v31 = vpack.c.bf16 %v783_v27, %v782_v26  ;;  %v784_v33 = vld [vmem:[#allocation8 + $0x50] sm:$0xff]  ;;  %v1024_v2 = vsub.s32 %v1021_v62, %v3634_v63  ;;  %vm1454_vm10 = vcmask 130112   ;;  %s3721_s20 = scalar_lea.vmem [#allocation15], %s3557_s6  ;;  %s4037_s18 = sld [smem:[#allocation30_spill]] }
 0x108   : > { %2596 = vmatprep.subr.bf16.mxu0 %v3189_v0  ;;  %v2603_v32 = vpack.c.bf16 %v697_v30, %v696_v29  ;;  %v785_v34 = vld [vmem:[#allocation8 + $0x58] sm:$0xff]  ;;  %v698_v35 = vld [vmem:[#allocation7 + $0x50] sm:$0xff]  ;;  %v786_v39 = vld [vmem:[#allocation8 + $0x60] sm:$0xff]  ;;  %vm1207_vm11 = vcmask 64512   ;;  %vm1543_vm12 = vcmask 1048064   ;;  %vm1775_vm13 = vcmask 261120  }
 0x109   : > { %2621 = vmatpush3.bf16.msra.mxu1 %v2618_v13  ;;  %v699_v36 = vld [vmem:[#allocation7 + $0x58] sm:$0xff]  ;;  %v2634_v37 = vpack.c.bf16 %v785_v34, %v784_v33  ;;  %v787_v40 = vld [vmem:[#allocation8 + $0x68] sm:$0xff]  ;;  %v700_v41 = vld [vmem:[#allocation7 + $0x60] sm:$0xff]  ;;  %s4038_s28 = sld [smem:[#allocation31_spill]]  ;;  %s4039_s12 = sld [smem:[#allocation33_spill]] }
 0x10a   : > { %2623 = vmatprep.subr.bf16.mxu1 %v2622_v18  ;;  %v2606_v38 = vpack.c.bf16 %v699_v36, %v698_v35  ;;  %v701_v42 = vld [vmem:[#allocation7 + $0x68] sm:$0xff]  ;;  %v2638_v43 = vpack.c.bf16 %v787_v40, %v786_v39  ;;  %v788_v45 = vld [vmem:[#allocation8 + $0x70] sm:$0xff]  ;;  %v789_v46 = vld [vmem:[#allocation8 + $0x78] sm:$0xff]  ;;  %s2262_s9 = sshll.u32 %s3303_s27, 7  ;;  %s4040_s16 = sld [smem:[#allocation37_spill]] }
 0x10b   : > { %2598 = vmatpush3.bf16.msra.mxu0 %v2597_v19  ;;  %v2609_v44 = vpack.c.bf16 %v701_v42, %v700_v41  ;;  %v702_v47 = vld [vmem:[#allocation7 + $0x70] sm:$0xff]  ;;  %v703_v48 = vld [vmem:[#allocation7 + $0x78] sm:$0xff]  ;;  %v2642_v49 = vpack.c.bf16 %v789_v46, %v788_v45  ;;  %v679_v51 = vld [vmem:[%s580_s11] sm:$0xff]  ;;  %s2019_s26 = scalar_lea.sflag [#allocation16], %s3554_s4  ;;  %p4041_p6 = scmp.ne.s32.totalorder %s4024_s15, 0 }
 0x10c   : > { %2599 = vmatprep.subr.bf16.mxu0 %v3189_v0  ;;  %v2612_v50 = vpack.c.bf16 %v703_v48, %v702_v47  ;;  %v3603_v52 = vld [vmem:[%s3592_s5 + $0x8] sm:$0xff]  ;;  %v3606_v53 = vld [vmem:[%s3592_s5 + $0x10] sm:$0xff]  ;;  %v3612_v54 = vld [vmem:[%s3592_s5 + $0x18] sm:$0xff]  ;;  %s3195_s14 = smov [#allocation15]  }
 0x10d   : > { %2625 = vmatpush3.bf16.msra.mxu1 %v2622_v18  ;;  %v3615_v55 = vld [vmem:[%s3592_s5 + $0x20] sm:$0xff]  ;;  %v3620_v56 = vld [vmem:[%s3592_s5 + $0x28] sm:$0xff]  ;;  %v3623_v57 = vld [vmem:[%s3592_s5 + $0x30] sm:$0xff]  ;;  %s3068_s8 = sshll.u32 %s3195_s14, 4  ;;  %s3069_s8 = int_to_ptr.vmem [resolvable:$false] %s3068_s8 }
 0x10e   : > { %2627 = vmatprep.subr.bf16.mxu1 %v2626_v24  ;;  %v3628_v58 = vld [vmem:[%s3592_s5 + $0x38] sm:$0xff] }
 0x10f   : > { %2601 = vmatpush3.bf16.msra.mxu0 %v2600_v25 }
 0x110   : > { %2602 = vmatprep.subr.bf16.mxu0 %v3189_v0  ;;  %s3900_s5 = scalar_lea.hbm %s4040_s16, %s2262_s9 }
 0x111   : > { %2629 = vmatpush3.bf16.msra.mxu1 %v2626_v24 }
 0x112   : > { %2631 = vmatprep.subr.bf16.mxu1 %v2630_v31 }
 0x113   : > { %2604 = vmatpush3.bf16.msra.mxu0 %v2603_v32 }
 0x114   : > { %2605 = vmatprep.subr.bf16.mxu0 %v3189_v0 }
 0x115   : > { %2633 = vmatpush3.bf16.msra.mxu1 %v2630_v31 }
 0x116   : > { %2635 = vmatprep.subr.bf16.mxu1 %v2634_v37 }
 0x117   : > { %2607 = vmatpush3.bf16.msra.mxu0 %v2606_v38 }
 0x118   : > { %2608 = vmatprep.subr.bf16.mxu0 %v3189_v0 }
 0x119   : > { %2637 = vmatpush3.bf16.msra.mxu1 %v2634_v37 }
 0x11a   : > { %2639 = vmatprep.subr.bf16.mxu1 %v2638_v43 }
 0x11b   : > { %2610 = vmatpush3.bf16.msra.mxu0 %v2609_v44 }
 0x11c   : > { %2611 = vmatprep.subr.bf16.mxu0 %v3189_v0 }
 0x11d   : > { %2641 = vmatpush3.bf16.msra.mxu1 %v2638_v43 }
 0x11e   : > { %2643 = vmatprep.subr.bf16.mxu1 %v2642_v49 }
 0x11f   : > { %2613 = vmatpush3.bf16.msra.mxu0 %v2612_v50 }
 0x121   : > { %2645 = vmatpush3.bf16.msra.mxu1 %v2642_v49 }
 0x122   : > { %2408 = vmatmul.mubr.f32.vlgmr.msra.gmra.mrb[0].mxu0 %v679_v51  ;;  %2678 = vmatprep.subr.bf16.mxu1 %v3189_v0 }
 0x123   : > { %2486 = vmatprep.mubr.f32.mxu0 %v680_v28 }
 0x124   : > { %2443 = vmatmul.mubr.f32.vlgmr.msra.gmra.mrb[0].mxu1 %v3603_v52 }
 0x125   : > { %2445 = vmatprep.mubr.f32.mxu1 %v3606_v53 }
 0x128   : > { %2446 = vmatmul.mubr.f32.gmra.mrb[2].mxu1 %v3612_v54 }
 0x129   : > { %2448 = vmatprep.mubr.f32.mxu1 %v3615_v55 }
 0x12c   : > { %2449 = vmatmul.mubr.f32.gmra.mrb[4].mxu1 %v3620_v56 }
 0x12d   : > { %2451 = vmatprep.mubr.f32.mxu1 %v3623_v57 }
 0x130   : > { %2452 = vmatmul.mubr.f32.gmra.mrb[6].mxu1 %v3628_v58 }
 0x131   : > { %2530 = vmatprep.mubr.msk.f32.mxu1 %vm3190_vm0, %v3191_v1 }
 0x1f5   : > { %v770_v3 = vpop.f32.mrb[0].mxu0 }
 0x1f6   : > { %v1018_v4 = vcombine.high %v770_v3, %v770_v3  ;;  %v1025_v5 = vrot.slane %v770_v3, %v1024_v2  ;;  %v2409_v6 = vpop.f32.mrb[1].mxu0 }
 0x1f7   : > { %v2444_v8 = vpop.f32.mrb[0].mxu1 }
 0x1f8   : > { %v1032_v9 = vrot.slane %v1018_v4, %v1024_v2  ;;  %v1033_v10 = vcombine.high %v1025_v5, %v1025_v5  ;;  %v1041_v11 = vrot.slane %v1025_v5, %v1024_v2  ;;  %v856_v12 = vpop.f32.mrb[1].mxu1 }
 0x1fa   : > { %v1034_v13 = vcombine.high %v1032_v9, %v1032_v9  ;;  %v1055_v14 = vrot.slane %v1033_v10, %v1024_v2  ;;  %v1070_v15 = vrot.slane %v1041_v11, %v3638_v7  ;;  %v1063_v16 = vcombine.high %v1041_v11, %v1041_v11 }
 0x1fb   : > { %v2447_v17 = vpop.f32.mrb[2].mxu1  ;;  %v1048_v18 = vrot.slane %v1032_v9, %v1024_v2 }
 0x1fc   : > { %v1074_v19 = vrot.slane %v1055_v14, %v3638_v7  ;;  %v1107_v20 = vmul.f32 %v1070_v15, %v856_v12  ;;  %v1065_v21 = vcombine.high %v1055_v14, %v1055_v14  ;;  %v866_v22 = vpop.f32.mrb[3].mxu1  ;;  %v1078_v23 = vrot.slane %v1063_v16, %v3638_v7 }
 0x1fd   : > { %v1062_v24 = vrot.slane %v1034_v13, %v1024_v2  ;;  %v1086_v30 = vrot.slane %v1048_v18, %v3638_v7  ;;  %v1064_v32 = vcombine.high %v1048_v18, %v1048_v18  ;;  %v1158_v15 = vand.u32 127, %v1022_v61 }
 0x1fe   : > { %v1108_v25 = vmul.f32 %v2444_v8, %v1074_v19  ;;  %v1082_v26 = vrot.slane %v1065_v21, %v3638_v7  ;;  %v1109_v27 = vmul.f32 %v1078_v23, %v866_v22  ;;  %1348 = vrot.lane.b32.xlu0 %v1107_v20, %s3193_s25  ;;  %v1116_v5 = vsel %vm1115_vm1, %v1107_v20, 0.0 }
 0x1ff   : > { %v2450_v28 = vpop.f32.mrb[4].mxu1  ;;  %v1090_v29 = vrot.slane %v1062_v24, %v3638_v7  ;;  %v1066_v31 = vcombine.high %v1062_v24, %v1062_v24  ;;  %v1094_v39 = vrot.slane %v1064_v32, %v3638_v7  ;;  %v1412_v16 = vadd.s32 4294967288, %v1158_v15 }
 0x200   : > { %v1110_v33 = vmul.f32 %v2447_v17, %v1082_v26  ;;  %v876_v34 = vpop.f32.mrb[5].mxu1  ;;  %1352 = vrot.lane.b32.xlu1 %v1109_v27, %s3193_s25  ;;  %v1122_v8 = vsel %vm1115_vm1, %v1109_v27, 0.0  ;;  %v1119_v9 = vsel %vm1115_vm1, %v1108_v25, 0.0 }
 0x201   : > { %v1112_v35 = vmul.f32 %v2450_v28, %v1090_v29  ;;  %v1111_v36 = vmul.f32 %v1086_v30, %v876_v34  ;;  %v1098_v37 = vrot.slane %v1066_v31, %v3638_v7  ;;  %v1415_v18 = vsub.s32 %v1412_v16, %v3634_v63 }
 0x202   : > { %1350 = vrot.lane.b32.xlu0 %v1108_v25, %s3193_s25  ;;  %v1125_v11 = vsel %vm1115_vm1, %v1110_v33, 0.0 }
 0x203   : > { %v2453_v38 = vpop.f32.mrb[6].mxu1  ;;  %v1128_v10 = vsel %vm1115_vm1, %v1111_v36, 0.0  ;;  %v1131_v13 = vsel %vm1115_vm1, %v1112_v35, 0.0 }
 0x204   : > { %v1114_v40 = vmul.f32 %v2453_v38, %v1098_v37  ;;  %v886_v41 = vpop.f32.mrb[7].mxu1  ;;  %1354 = vrot.lane.b32.xlu1 %v1110_v33, %s3193_s25 }
 0x205   : > { %v1113_v42 = vmul.f32 %v1094_v39, %v886_v41 }
 0x206   : > { %1356 = vrot.lane.b32.xlu0 %v1111_v36, %s3193_s25  ;;  %v1137_v14 = vsel %vm1115_vm1, %v1114_v40, 0.0 }
 0x207   : > { %v1134_v12 = vsel %vm1115_vm1, %v1113_v42, 0.0 }
 0x208   : > { %1358 = vrot.lane.b32.xlu1 %v1112_v35, %s3193_s25 }
 0x20a   : > { %1360 = vrot.lane.b32.xlu0 %v1113_v42, %s3193_s25 }
 0x20c   : > { %1362 = vrot.lane.b32.xlu1 %v1114_v40, %s3193_s25  ;;  %s4036_s25 = sld [smem:[#allocation32_spill]] }
 0x270   : > { %v1349_v43 = vpop.permute.xlu0 %1348 }
 0x271   : > { %v1372_v44 = vsel %vm1115_vm1, %v1349_v43, 0.0 }
 0x272   : > { %v1353_v45 = vpop.permute.xlu1 %1352  ;;  %1373 = vadd.xlane.f32.xlu0 %v1372_v44  ;;  %v1016_v44 = vld [vmem:[%s589_s17] sm:$0xff] }
 0x273   : > { %v1378_v47 = vsel %vm1115_vm1, %v1353_v45, 0.0  ;;  %vm1148_vm9 = vcmp.ne.s32.totalorder %v1016_v44, 0  ;;  %v903_v44 = vld [vmem:[#allocation10 + $0x40] sm:$0xff] }
 0x274   : > { %v1351_v46 = vpop.permute.xlu0 %1350 }
 0x275   : > { %v1375_v48 = vsel %vm1115_vm1, %v1351_v46, 0.0 }
 0x276   : > { %v1355_v49 = vpop.permute.xlu1 %1354  ;;  %1379 = vadd.xlane.f32.xlu0 %v1378_v47  ;;  %1376 = vadd.xlane.f32.xlu1 %v1375_v48  ;;  %v1161_v48 = vsub.s32 %v1158_v15, %v3634_v63 }
 0x277   : > { %v1381_v51 = vsel %vm1115_vm1, %v1355_v49, 0.0 }
 0x278   : > { %v1357_v50 = vpop.permute.xlu0 %1356 }
 0x279   : > { %v1384_v59 = vsel %vm1115_vm1, %v1357_v50, 0.0 }
 0x27a   : > { %1382 = vadd.xlane.f32.xlu0 %v1381_v51  ;;  %v1359_v60 = vpop.permute.xlu1 %1358  ;;  %1385 = vadd.xlane.f32.xlu1 %v1384_v59 }
 0x27b   : > { %v1387_v2 = vsel %vm1115_vm1, %v1359_v60, 0.0 }
 0x27c   : > { %v1361_v62 = vpop.permute.xlu0 %1360 }
 0x27d   : > { %v1390_v3 = vsel %vm1115_vm1, %v1361_v62, 0.0 }
 0x27e   : > { %1388 = vadd.xlane.f32.xlu0 %v1387_v2  ;;  %1391 = vadd.xlane.f32.xlu1 %v1390_v3  ;;  %v1363_v4 = vpop.permute.xlu1 %1362 }
 0x27f   : > { %v1393_v6 = vsel %vm1115_vm1, %v1363_v4, 0.0 }
 0x282   : > { %1117 = vadd.xlane.f32.xlu1 %v1116_v5  ;;  %1394 = vadd.xlane.f32.xlu0 %v1393_v6 }
 0x286   : > { %1123 = vadd.xlane.f32.xlu1 %v1122_v8  ;;  %1120 = vadd.xlane.f32.xlu0 %v1119_v9 }
 0x28a   : > { %1129 = vadd.xlane.f32.xlu1 %v1128_v10  ;;  %1126 = vadd.xlane.f32.xlu0 %v1125_v11 }
 0x28e   : > { %1135 = vadd.xlane.f32.xlu1 %v1134_v12  ;;  %1132 = vadd.xlane.f32.xlu0 %v1131_v13 }
 0x292   : > { %1138 = vadd.xlane.f32.xlu0 %v1137_v14 }
 0x2ff   : > { %v1374_v17 = vpop.xlane.xlu0 %1373 }
 0x300   : > { %v1396_v19 = vmul.f32 0.125, %v1374_v17 }
 0x302   : > { %v1416_v24 = vrot.slane %v1396_v19, %v1415_v18 }
 0x303   : > { %v1380_v20 = vpop.xlane.xlu0 %1379  ;;  %v1377_v21 = vpop.xlane.xlu1 %1376 }
 0x304   : > { %v1398_v22 = vmul.f32 0.125, %v1380_v20  ;;  %v1397_v23 = vmul.f32 0.125, %v1377_v21 }
 0x306   : > { %v1420_v25 = vrot.slane %v1397_v23, %v1415_v18  ;;  %v1424_v26 = vrot.slane %v1398_v22, %v1415_v18 }
 0x307   : > { %v1383_v27 = vpop.xlane.xlu0 %1382  ;;  %v1386_v28 = vpop.xlane.xlu1 %1385 }
 0x308   : > { %v1445_v29 = vsel %vm1191_vm2, %v1420_v25, %v1416_v24  ;;  %v1399_v30 = vmul.f32 0.125, %v1383_v27  ;;  %v1400_v61 = vmul.f32 0.125, %v1386_v28 }
 0x309   : > { %v1446_v32 = vsel %vm1193_vm3, %v1424_v26, %v1445_v29 }
 0x30a   : > { %v1428_v31 = vrot.slane %v1399_v30, %v1415_v18  ;;  %v1432_v33 = vrot.slane %v1400_v61, %v1415_v18 }
 0x30b   : > { %v1389_v34 = vpop.xlane.xlu0 %1388  ;;  %v1392_v35 = vpop.xlane.xlu1 %1391 }
 0x30c   : > { %v1447_v36 = vsel %vm1195_vm4, %v1428_v31, %v1446_v32  ;;  %v1401_v37 = vmul.f32 0.125, %v1389_v34  ;;  %v1402_v38 = vmul.f32 0.125, %v1392_v35  ;;  %v895_v32 = vld [vmem:[#allocation10] sm:$0xff]  ;;  %v897_v34 = vld [vmem:[#allocation10 + $0x10] sm:$0xff] }
 0x30d   : > { %v1448_v40 = vsel %vm1197_vm5, %v1432_v33, %v1447_v36  ;;  %v896_v33 = vld [vmem:[#allocation10 + $0x8] sm:$0xff]  ;;  %v898_v36 = vld [vmem:[#allocation10 + $0x18] sm:$0xff] }
 0x30e   : > { %v1436_v39 = vrot.slane %v1401_v37, %v1415_v18  ;;  %v1440_v41 = vrot.slane %v1402_v38, %v1415_v18  ;;  %v2646_v35 = vpack.c.bf16 %v896_v33, %v895_v32  ;;  %v2650_v37 = vpack.c.bf16 %v898_v36, %v897_v34  ;;  %v899_v38 = vld [vmem:[#allocation10 + $0x20] sm:$0xff]  ;;  %v1635_v34 = vld [vmem:[#allocation11 + $0x10] sm:$0xff] }
 0x30f   : > { %v1395_v42 = vpop.xlane.xlu0 %1394  ;;  %v1118_v43 = vpop.xlane.xlu1 %1117 }
 0x310   : > { %v1403_v45 = vmul.f32 0.125, %v1395_v42  ;;  %v1449_v46 = vsel %vm1199_vm6, %v1436_v39, %v1448_v40  ;;  %v1140_v49 = vmul.f32 0.125, %v1118_v43  ;;  %v900_v39 = vld [vmem:[#allocation10 + $0x28] sm:$0xff]  ;;  %2647 = vmatprep.subr.bf16.mxu0 %v2646_v35  ;;  %v902_v42 = vld [vmem:[#allocation10 + $0x38] sm:$0xff] }
 0x311   : > { %v1450_v59 = vsel %vm1201_vm7, %v1440_v41, %v1449_v46  ;;  %2649 = vmatpush3.bf16.msra.mxu0 %v2646_v35  ;;  %v2654_v40 = vpack.c.bf16 %v900_v39, %v899_v38  ;;  %v901_v41 = vld [vmem:[#allocation10 + $0x30] sm:$0xff]  ;;  %v1636_v35 = vld [vmem:[#allocation11 + $0x18] sm:$0xff] }
 0x312   : > { %v1444_v47 = vrot.slane %v1403_v45, %v1415_v18  ;;  %v1162_v4 = vrot.slane %v1140_v49, %v1161_v48  ;;  %2651 = vmatprep.subr.bf16.mxu0 %v2650_v37  ;;  %v2658_v43 = vpack.c.bf16 %v902_v42, %v901_v41  ;;  %v904_v45 = vld [vmem:[#allocation10 + $0x48] sm:$0xff] }
 0x313   : > { %v1121_v50 = vpop.xlane.xlu0 %1120  ;;  %v1124_v51 = vpop.xlane.xlu1 %1123  ;;  %v2662_v46 = vpack.c.bf16 %v904_v45, %v903_v44  ;;  %v1638_v41 = vld [vmem:[#allocation11 + $0x28] sm:$0xff]  ;;  %v1264_v45 = vsub.s32 6, %v3634_v63 }
 0x314   : > { %v1141_v60 = vmul.f32 0.125, %v1121_v50  ;;  %v1142_v62 = vmul.f32 0.125, %v1124_v51  ;;  %v1451_v2 = vsel %vm1203_vm8, %v1444_v47, %v1450_v59  ;;  %v905_v47 = vld [vmem:[#allocation10 + $0x50] sm:$0xff]  ;;  %v907_v50 = vld [vmem:[#allocation10 + $0x60] sm:$0xff]  ;;  %v908_v51 = vld [vmem:[#allocation10 + $0x68] sm:$0xff] }
 0x315   : > { %v3677_v3 = vsel %vm1148_vm9, -1e+10, %v1451_v2  ;;  %2653 = vmatpush3.bf16.msra.mxu0 %v2650_v37  ;;  %v2670_v59 = vpack.c.bf16 %v908_v51, %v907_v50  ;;  %v2682_v37 = vpack.c.bf16 %v1636_v35, %v1635_v34  ;;  %v1271_v50 = vsub.s32 7, %v3634_v63  ;;  %v1641_v51 = vld [vmem:[#allocation11 + $0x40] sm:$0xff] }
 0x316   : > { %v1166_v5 = vrot.slane %v1141_v60, %v1161_v48  ;;  %v1455_v6 = vsel %vm1454_vm10, %v3677_v3, -inf  ;;  %v1170_v8 = vrot.slane %v1142_v62, %v1161_v48  ;;  %2655 = vmatprep.subr.bf16.mxu0 %v2654_v40  ;;  %v909_v60 = vld [vmem:[#allocation10 + $0x70] sm:$0xff]  ;;  %v910_v62 = vld [vmem:[#allocation10 + $0x78] sm:$0xff] }
 0x317   : > { %v1127_v9 = vpop.xlane.xlu0 %1126  ;;  %1456 = vmax.xlane.f32.xlu1 %v1455_v6  ;;  %v1130_v10 = vpop.xlane.xlu1 %1129  ;;  %v2674_v2 = vpack.c.bf16 %v910_v62, %v909_v60 }
 0x318   : > { %v1192_v11 = vsel %vm1191_vm2, %v1166_v5, %v1162_v4  ;;  %v1143_v12 = vmul.f32 0.125, %v1127_v9  ;;  %v1144_v13 = vmul.f32 0.125, %v1130_v10 }
 0x319   : > { %v1194_v15 = vsel %vm1193_vm3, %v1170_v8, %v1192_v11  ;;  %2657 = vmatpush3.bf16.msra.mxu0 %v2654_v40  ;;  %v1637_v40 = vld [vmem:[#allocation11 + $0x20] sm:$0xff] }
 0x31a   : > { %v1174_v14 = vrot.slane %v1143_v12, %v1161_v48  ;;  %v1178_v16 = vrot.slane %v1144_v13, %v1161_v48  ;;  %2659 = vmatprep.subr.bf16.mxu0 %v2658_v43  ;;  %v1229_v13 = vsub.s32 1, %v3634_v63  ;;  %v2685_v42 = vpack.c.bf16 %v1638_v41, %v1637_v40 }
 0x31b   : > { %v1133_v17 = vpop.xlane.xlu0 %1132  ;;  %v1136_v18 = vpop.xlane.xlu1 %1135 }
 0x31c   : > { %v1196_v19 = vsel %vm1195_vm4, %v1174_v14, %v1194_v15  ;;  %v1145_v20 = vmul.f32 0.125, %v1133_v17  ;;  %v1146_v21 = vmul.f32 0.125, %v1136_v18  ;;  %v1236_v18 = vsub.s32 2, %v3634_v63 }
 0x31d   : > { %v1198_v23 = vsel %vm1197_vm5, %v1178_v16, %v1196_v19  ;;  %2661 = vmatpush3.bf16.msra.mxu0 %v2658_v43 }
 0x31e   : > { %v1182_v22 = vrot.slane %v1145_v20, %v1161_v48  ;;  %v1186_v24 = vrot.slane %v1146_v21, %v1161_v48  ;;  %2663 = vmatprep.subr.bf16.mxu0 %v2662_v46 }
 0x31f   : > { %v1139_v25 = vpop.xlane.xlu0 %1138 }
 0x320   : > { %v1147_v26 = vmul.f32 0.125, %v1139_v25  ;;  %v1200_v27 = vsel %vm1199_vm6, %v1182_v22, %v1198_v23  ;;  %v1243_v22 = vsub.s32 3, %v3634_v63 }
 0x321   : > { %v1202_v29 = vsel %vm1201_vm7, %v1186_v24, %v1200_v27  ;;  %2665 = vmatpush3.bf16.msra.mxu0 %v2662_v46  ;;  %v1250_v24 = vsub.s32 4, %v3634_v63  ;;  %v1639_v46 = vld [vmem:[#allocation11 + $0x30] sm:$0xff] }
 0x322   : > { %v1190_v28 = vrot.slane %v1147_v26, %v1161_v48  ;;  %v906_v48 = vld [vmem:[#allocation10 + $0x58] sm:$0xff]  ;;  %v1257_v26 = vsub.s32 5, %v3634_v63 }
 0x323   : > { %v2666_v49 = vpack.c.bf16 %v906_v48, %v905_v47  ;;  %v1640_v47 = vld [vmem:[#allocation11 + $0x38] sm:$0xff] }
 0x324   : > { %v1204_v30 = vsel %vm1203_vm8, %v1190_v28, %v1202_v29  ;;  %v1633_v29 = vld [vmem:[#allocation11] sm:$0xff] }
 0x325   : > { %v1206_v61 = vsel %vm1148_vm9, -1e+10, %v1204_v30  ;;  %2667 = vmatprep.subr.bf16.mxu0 %v2666_v49  ;;  %v1634_v30 = vld [vmem:[#allocation11 + $0x8] sm:$0xff] }
 0x326   : > { %v1208_v31 = vsel %vm1207_vm11, %v1206_v61, -inf  ;;  %2669 = vmatpush3.bf16.msra.mxu0 %v2666_v49 }
 0x327   : > { %1209 = vmax.xlane.f32.xlu0 %v1208_v31  ;;  %2671 = vmatprep.subr.bf16.mxu0 %v2670_v59 }
 0x32a   : > { %2673 = vmatpush3.bf16.msra.mxu0 %v2670_v59  ;;  %v1642_v59 = vld [vmem:[#allocation11 + $0x48] sm:$0xff] }
 0x32b   : > { %2675 = vmatprep.subr.bf16.mxu0 %v2674_v2  ;;  %v2691_v60 = vpack.c.bf16 %v1642_v59, %v1641_v51 }
 0x32e   : > { %2677 = vmatpush3.bf16.msra.mxu0 %v2674_v2 }
 0x32f   : > { %2708 = vmatprep.subr.bf16.mxu0 %v3189_v0 }
 0x331   : > { %2487 = vmatmul.mubr.f32.vlgmr.msra.gmra.mrb[2].mxu0 %v3603_v52 }
 0x332   : > { %2489 = vmatprep.mubr.f32.mxu0 %v3606_v53 }
 0x335   : > { %2490 = vmatmul.mubr.f32.gmra.mrb[4].mxu0 %v3612_v54 }
 0x336   : > { %2492 = vmatprep.mubr.f32.mxu0 %v3615_v55 }
 0x339   : > { %2493 = vmatmul.mubr.f32.gmra.mrb[6].mxu0 %v3620_v56 }
 0x33a   : > { %2495 = vmatprep.mubr.f32.mxu0 %v3623_v57 }
 0x33d   : > { %2496 = vmatmul.mubr.f32.gmra.mrb[8].mxu0 %v3628_v58 }
 0x33e   : > { %2576 = vmatprep.mubr.msk.f32.mxu0 %vm3190_vm0, %v3191_v1 }
 0x3a4   : > { %v1457_v4 = vpop.xlane.xlu1 %1456 }
 0x3a5   : > { %v1458_v5 = vsub.f32 %v3677_v3, %v1457_v4  ;;  %v1643_v4 = vld [vmem:[#allocation11 + $0x50] sm:$0xff] }
 0x3a7   : > { %v1459_v6 = vmul.f32 1.442695, %v1458_v5  ;;  %v1644_v5 = vld [vmem:[#allocation11 + $0x58] sm:$0xff] }
 0x3a9   : > { %2853 = vpow2.f32 %v1459_v6  ;;  %v2694_v6 = vpack.c.bf16 %v1644_v5, %v1643_v4 }
 0x3b3   : > { %v2854_v52 = vpop.eup %2853 }
 0x3b4   : > { %1462 = vrot.lane.b32.xlu1 %v2854_v52, %s3194_s13  ;;  %v1210_v53 = vpop.xlane.xlu0 %1209  ;;  %s2045_s13 = sshll.u32 %s3721_s20, 4  ;;  %s2046_s13 = int_to_ptr.vmem [resolvable:$true] %s2045_s13 }
 0x3b5   : > { %v1211_v54 = vsub.f32 %v1206_v61, %v1210_v53  ;;  %v2679_v61 = vpack.c.bf16 %v1634_v30, %v1633_v29  ;;  %p3071_p9 = scmp.lt.s32.totalorder %s2046_s13, %s3069_s8 }
 0x3b7   : > { %v1212_v55 = vmul.f32 1.442695, %v1211_v54  ;;  %2680 = vmatpush3.bf16.msra.mxu1 %v2679_v61  ;;  %v1645_v54 = vld [vmem:[#allocation11 + $0x60] sm:$0xff] }
 0x3b8   : > { %2681 = vmatprep.subr.bf16.mxu1 %v3189_v0 }
 0x3b9   : > { %2855 = vpow2.f32 %v1212_v55  ;;  %v1646_v55 = vld [vmem:[#allocation11 + $0x68] sm:$0xff] }
 0x3bb   : > { %2683 = vmatpush3.bf16.msra.mxu1 %v2682_v37 }
 0x3bc   : > { %2684 = vmatprep.subr.bf16.mxu1 %v3189_v0 }
 0x3bf   : > { %2686 = vmatpush3.bf16.msra.mxu1 %v2685_v42 }
 0x3c0   : > { %2687 = vmatprep.subr.bf16.mxu1 %v3189_v0 }
 0x3c3   : > { %v2856_v56 = vpop.eup %2855 }
 0x3c4   : > { %v1214_v57 = vsel %vm1207_vm11, %v2856_v56, 0.0 }
 0x3c5   : > { %1215 = vadd.xlane.f32.xlu0 %v1214_v57 }
 0x404   : > { %v3703_v9 = vpop.f32.mrb[2].mxu0 }
 0x405   : > { %v3705_v10 = vpop.f32.mrb[3].mxu0 }
 0x408   : > { %v3707_v11 = vpop.f32.mrb[4].mxu0 }
 0x409   : > { %v3709_v12 = vpop.f32.mrb[5].mxu0 }
 0x40c   : > { %v3718_v19 = vpop.f32.mrb[6].mxu0 }
 0x40d   : > { %v3726_v20 = vpop.f32.mrb[7].mxu0 }
 0x410   : > { %v3735_v31 = vpop.f32.mrb[8].mxu0 }
 0x411   : > { %v3737_v33 = vpop.f32.mrb[9].mxu0 }
 0x426   : > { %v1463_v58 = vpop.permute.xlu1 %1462 }
 0x427   : > { %v1465_v8 = vsel %vm1207_vm11, %v1463_v58, 0.0  ;;  %v2697_v58 = vpack.c.bf16 %v1646_v55, %v1645_v54 }
 0x428   : > { %1466 = vadd.xlane.f32.xlu0 %v1465_v8 }
 0x452   : > { %v1216_v3 = vpop.xlane.xlu0 %1215 }
 0x453   : > { %2857 = vrcp.f32 %v1216_v3 }
 0x45d   : > { %v2858_v14 = vpop.eup %2857 }
 0x45e   : > { %v3712_v15 = vmul.f32 %v2858_v14, %v2856_v56 }
 0x460   : > { %v1230_v16 = vrot.slane %v3712_v15, %v1229_v13  ;;  %v1223_v17 = vrot.slane %v3712_v15, %v3638_v7  ;;  %1219 = vst.msk [vmem:[%s3721_s20] sm:$0xff] %vm1207_vm11, %v3712_v15  ;;  %v1237_v21 = vrot.slane %v3712_v15, %v1236_v18  ;;  %v1244_v23 = vrot.slane %v3712_v15, %v1243_v22 }
 0x461   : > { %v1251_v25 = vrot.slane %v3712_v15, %v1250_v24  ;;  %v1258_v27 = vrot.slane %v3712_v15, %v1257_v26  ;;  %v1265_v49 = vrot.slane %v3712_v15, %v1264_v45  ;;  %v1272_v2 = vrot.slane %v3712_v15, %v1271_v50 }
 0x462   : > { %1232 = vbcast.lane.b32.xlu1 %v1230_v16, 256  ;;  %1225 = vbcast.lane.b32.xlu0 %v1223_v17, 256  ;;  %v1647_v17 = vld [vmem:[#allocation11 + $0x70] sm:$0xff] }
 0x466   : > { %1239 = vbcast.lane.b32.xlu1 %v1237_v21, 256 }
 0x46a   : > { %1246 = vbcast.lane.b32.xlu1 %v1244_v23, 256 }
 0x46e   : > { %1253 = vbcast.lane.b32.xlu1 %v1251_v25, 256 }
 0x472   : > { %1260 = vbcast.lane.b32.xlu1 %v1258_v27, 256 }
 0x4b5   : > { %v1467_v28 = vpop.xlane.xlu0 %1466 }
 0x4b6   : > { %2859 = vrcp.f32 %v1467_v28 }
 0x4c0   : > { %v2860_v32 = vpop.eup %2859 }
 0x4c1   : > { %v1469_v36 = vmul.f32 %v2860_v32, %v2854_v52 }
 0x4c3   : > { %v1490_v38 = vrot.slane %v1469_v36, %v1236_v18  ;;  %v1474_v39 = vrot.slane %v1469_v36, %v3638_v7  ;;  %1470 = vst.msk [vmem:[%s3721_s20] sm:$0xff] %vm1454_vm10, %v1469_v36  ;;  %v1498_v43 = vrot.slane %v1469_v36, %v1243_v22  ;;  %v1482_v44 = vrot.slane %v1469_v36, %v1229_v13  ;;  %v1648_v18 = vld [vmem:[#allocation11 + $0x78] sm:$0xff] }
 0x4c4   : > { %v2688_v7 = vpack.c.bf16 %v1640_v47, %v1639_v46  ;;  %v1506_v48 = vrot.slane %v1469_v36, %v1250_v24  ;;  %v1514_v62 = vrot.slane %v1469_v36, %v1257_v26  ;;  %v1522_v63 = vrot.slane %v1469_v36, %v1264_v45 }
 0x4c5   : > { %1493 = vbcast.lane.b32.xlu0 %v1490_v38, 264  ;;  %1477 = vbcast.lane.b32.xlu1 %v1474_v39, 264  ;;  %v1530_v13 = vrot.slane %v1469_v36, %v1271_v50  ;;  %v2700_v22 = vpack.c.bf16 %v1648_v18, %v1647_v17 }
 0x4c6   : > { %2689 = vmatpush3.bf16.msra.mxu1 %v2688_v7 }
 0x4c7   : > { %2690 = vmatprep.subr.bf16.mxu1 %v3189_v0 }
 0x4c9   : > { %1501 = vbcast.lane.b32.xlu0 %v1498_v43, 264  ;;  %1485 = vbcast.lane.b32.xlu1 %v1482_v44, 264 }
 0x4ca   : > { %2692 = vmatpush3.bf16.msra.mxu1 %v2691_v60 }
 0x4cb   : > { %2693 = vmatprep.subr.bf16.mxu1 %v3189_v0 }
 0x4cd   : > { %1509 = vbcast.lane.b32.xlu0 %v1506_v48, 264  ;;  %1267 = vbcast.lane.b32.xlu1 %v1265_v49, 256 }
 0x4ce   : > { %2695 = vmatpush3.bf16.msra.mxu1 %v2694_v6 }
 0x4cf   : > { %2696 = vmatprep.subr.bf16.mxu1 %v3189_v0 }
 0x4d1   : > { %1517 = vbcast.lane.b32.xlu0 %v1514_v62, 264  ;;  %1274 = vbcast.lane.b32.xlu1 %v1272_v2, 256 }
 0x4d2   : > { %2698 = vmatpush3.bf16.msra.mxu1 %v2697_v58 }
 0x4d3   : > { %2699 = vmatprep.subr.bf16.mxu1 %v3189_v0 }
 0x4d4   : > { %v1233_v52 = vpop.permute.xlu1 %1232  ;;  %v1226_v53 = vpop.permute.xlu0 %1225 }
 0x4d5   : > { %v1277_v56 = vmul.f32 %v3703_v9, %v1233_v52  ;;  %v1276_v57 = vmul.f32 %v1226_v53, %v3705_v10  ;;  %1525 = vbcast.lane.b32.xlu0 %v1522_v63, 264 }
 0x4d6   : > { %2701 = vmatpush3.bf16.msra.mxu1 %v2700_v22 }
 0x4d7   : > { %v1291_v8 = vsel %vm1115_vm1, %v1277_v56, 0.0  ;;  %v1284_v3 = vsel %vm1115_vm1, %v1276_v57, 0.0  ;;  %2702 = vmatprep.subr.bf16.mxu1 %v3189_v0 }
 0x4d8   : > { %v1292_v14 = vrot.slane %v1291_v8, 4  ;;  %v1285_v15 = vrot.slane %v1284_v3, 4  ;;  %v1240_v16 = vpop.permute.xlu1 %1239 }
 0x4d9   : > { %v1278_v21 = vmul.f32 %v1240_v16, %v3709_v12  ;;  %1533 = vbcast.lane.b32.xlu0 %v1530_v13, 264 }
 0x4da   : > { %v1293_v23 = vadd.f32 %v1292_v14, %v1291_v8  ;;  %v1286_v24 = vadd.f32 %v1285_v15, %v1284_v3 }
 0x4db   : > { %v1298_v25 = vsel %vm1115_vm1, %v1278_v21, 0.0 }
 0x4dc   : > { %v1294_v26 = vrot.slane %v1293_v23, 2  ;;  %v1287_v27 = vrot.slane %v1286_v24, 2  ;;  %v1299_v28 = vrot.slane %v1298_v25, 4  ;;  %v1247_v29 = vpop.permute.xlu1 %1246 }
 0x4dd   : > { %v1279_v30 = vmul.f32 %v3707_v11, %v1247_v29 }
 0x4de   : > { %v1295_v61 = vadd.f32 %v1294_v26, %v1293_v23  ;;  %v1288_v32 = vadd.f32 %v1287_v27, %v1286_v24  ;;  %v1300_v34 = vadd.f32 %v1299_v28, %v1298_v25 }
 0x4df   : > { %v1305_v35 = vsel %vm1115_vm1, %v1279_v30, 0.0 }
 0x4e0   : > { %v1296_v36 = vrot.slane %v1295_v61, 1  ;;  %v1289_v37 = vrot.slane %v1288_v32, 1  ;;  %v1301_v38 = vrot.slane %v1300_v34, 2  ;;  %v1306_v39 = vrot.slane %v1305_v35, 4  ;;  %v1254_v40 = vpop.permute.xlu1 %1253 }
 0x4e1   : > { %v1280_v41 = vmul.f32 %v1254_v40, %v3726_v20 }
 0x4e2   : > { %v1297_v42 = vadd.f32 %v1296_v36, %v1295_v61  ;;  %v1290_v43 = vadd.f32 %v1289_v37, %v1288_v32  ;;  %v1302_v44 = vadd.f32 %v1301_v38, %v1300_v34  ;;  %v1307_v45 = vadd.f32 %v1306_v39, %v1305_v35 }
 0x4e3   : > { %v1312_v46 = vsel %vm1115_vm1, %v1280_v41, 0.0 }
 0x4e4   : > { %v1608_v47 = vsel %vm1191_vm2, %v1297_v42, %v1290_v43  ;;  %v1303_v7 = vrot.slane %v1302_v44, 1  ;;  %v1308_v48 = vrot.slane %v1307_v45, 2  ;;  %v1313_v49 = vrot.slane %v1312_v46, 4  ;;  %v1261_v50 = vpop.permute.xlu1 %1260 }
 0x4e5   : > { %v1281_v51 = vmul.f32 %v3718_v19, %v1261_v50 }
 0x4e6   : > { %v1304_v59 = vadd.f32 %v1303_v7, %v1302_v44  ;;  %v1309_v60 = vadd.f32 %v1308_v48, %v1307_v45  ;;  %v1314_v62 = vadd.f32 %v1313_v49, %v1312_v46 }
 0x4e7   : > { %v1319_v2 = vsel %vm1115_vm1, %v1281_v51, 0.0 }
 0x4e8   : > { %v1609_v4 = vsel %vm1193_vm3, %v1304_v59, %v1608_v47  ;;  %v1310_v5 = vrot.slane %v1309_v60, 1  ;;  %v1315_v6 = vrot.slane %v1314_v62, 2  ;;  %v1320_v63 = vrot.slane %v1319_v2, 4 }
 0x4ea   : > { %v1311_v52 = vadd.f32 %v1310_v5, %v1309_v60  ;;  %v1316_v53 = vadd.f32 %v1315_v6, %v1314_v62  ;;  %v1321_v54 = vadd.f32 %v1320_v63, %v1319_v2 }
 0x4ec   : > { %v1610_v55 = vsel %vm1195_vm4, %v1311_v52, %v1609_v4  ;;  %v1317_v56 = vrot.slane %v1316_v53, 1  ;;  %v1322_v57 = vrot.slane %v1321_v54, 2 }
 0x4ee   : > { %v1318_v58 = vadd.f32 %v1317_v56, %v1316_v53  ;;  %v1323_v8 = vadd.f32 %v1322_v57, %v1321_v54 }
 0x4f0   : > { %v1611_v3 = vsel %vm1197_vm5, %v1318_v58, %v1610_v55  ;;  %v1324_v13 = vrot.slane %v1323_v8, 1 }
 0x4f2   : > { %v1325_v14 = vadd.f32 %v1324_v13, %v1323_v8 }
 0x4f4   : > { %v3771_v15 = vsel %vm1199_vm6, %v1325_v14, %v1611_v3 }
 0x537   : > { %v1478_v16 = vpop.permute.xlu1 %1477  ;;  %v1494_v17 = vpop.permute.xlu0 %1493 }
 0x538   : > { %v1535_v18 = vmul.f32 %v1478_v16, %v3705_v10  ;;  %v1537_v21 = vmul.f32 %v1494_v17, %v3709_v12 }
 0x53a   : > { %v1544_v22 = vsel %vm1543_vm12, %v1535_v18, 0.0  ;;  %v1558_v23 = vsel %vm1543_vm12, %v1537_v21, 0.0 }
 0x53b   : > { %v1545_v24 = vrot.slane %v1544_v22, 4  ;;  %v1559_v25 = vrot.slane %v1558_v23, 4  ;;  %v1486_v26 = vpop.permute.xlu1 %1485  ;;  %v1502_v27 = vpop.permute.xlu0 %1501 }
 0x53c   : > { %v1536_v28 = vmul.f32 %v3703_v9, %v1486_v26  ;;  %v1538_v29 = vmul.f32 %v3707_v11, %v1502_v27 }
 0x53d   : > { %v1546_v30 = vadd.f32 %v1545_v24, %v1544_v22  ;;  %v1560_v61 = vadd.f32 %v1559_v25, %v1558_v23 }
 0x53e   : > { %v1551_v32 = vsel %vm1543_vm12, %v1536_v28, 0.0  ;;  %v1565_v10 = vsel %vm1543_vm12, %v1538_v29, 0.0 }
 0x53f   : > { %v1547_v34 = vrot.slane %v1546_v30, 2  ;;  %v1561_v12 = vrot.slane %v1560_v61, 2  ;;  %v1552_v35 = vrot.slane %v1551_v32, 4  ;;  %v1566_v36 = vrot.slane %v1565_v10, 4  ;;  %v1268_v37 = vpop.permute.xlu1 %1267  ;;  %v1510_v38 = vpop.permute.xlu0 %1509 }
 0x540   : > { %v1539_v39 = vmul.f32 %v1510_v38, %v3726_v20  ;;  %v1282_v40 = vmul.f32 %v1268_v37, %v3737_v33 }
 0x541   : > { %v1548_v41 = vadd.f32 %v1547_v34, %v1546_v30  ;;  %v1562_v9 = vadd.f32 %v1561_v12, %v1560_v61  ;;  %v1553_v42 = vadd.f32 %v1552_v35, %v1551_v32  ;;  %v1567_v11 = vadd.f32 %v1566_v36, %v1565_v10 }
 0x542   : > { %v1572_v43 = vsel %vm1543_vm12, %v1539_v39, 0.0  ;;  %v1326_v44 = vsel %vm1115_vm1, %v1282_v40, 0.0 }
 0x543   : > { %v1549_v45 = vrot.slane %v1548_v41, 1  ;;  %v1554_v46 = vrot.slane %v1553_v42, 2  ;;  %v1568_v47 = vrot.slane %v1567_v11, 2  ;;  %v1275_v7 = vpop.permute.xlu1 %1274  ;;  %v1518_v48 = vpop.permute.xlu0 %1517  ;;  %v1573_v49 = vrot.slane %v1572_v43, 4 }
 0x544   : > { %v1327_v50 = vrot.slane %v1326_v44, 4  ;;  %v1283_v51 = vmul.f32 %v3735_v31, %v1275_v7  ;;  %v1540_v20 = vmul.f32 %v3718_v19, %v1518_v48  ;;  %v1563_v59 = vrot.slane %v1562_v9, 1 }
 0x545   : > { %v1555_v60 = vadd.f32 %v1554_v46, %v1553_v42  ;;  %v1569_v62 = vadd.f32 %v1568_v47, %v1567_v11  ;;  %v1574_v2 = vadd.f32 %v1573_v49, %v1572_v43  ;;  %v1550_v56 = vadd.f32 %v1549_v45, %v1548_v41 }
 0x546   : > { %v1328_v4 = vadd.f32 %v1327_v50, %v1326_v44  ;;  %v1333_v5 = vsel %vm1115_vm1, %v1283_v51, 0.0  ;;  %v1579_v6 = vsel %vm1543_vm12, %v1540_v20, 0.0  ;;  %v1564_v19 = vadd.f32 %v1563_v59, %v1562_v9  ;;  %v2253_v20 = vld [vmem:[%s3982_s7] ss:$0 sm:$0xff] }
 0x547   : > { %v1556_v63 = vrot.slane %v1555_v60, 1  ;;  %v1570_v52 = vrot.slane %v1569_v62, 1  ;;  %v1334_v53 = vrot.slane %v1333_v5, 4  ;;  %v1580_v54 = vrot.slane %v1579_v6, 4  ;;  %v1526_v55 = vpop.permute.xlu0 %1525 }
 0x548   : > { %v1575_v57 = vrot.slane %v1574_v2, 2  ;;  %v1329_v58 = vrot.slane %v1328_v4, 2  ;;  %v1541_v8 = vmul.f32 %v1526_v55, %v3737_v33  ;;  %v1759_v55 = vld [vmem:[%s3985_s10 + $0x20] sm:$0xff] }
 0x549   : > { %v1557_v3 = vadd.f32 %v1556_v63, %v1555_v60  ;;  %v1335_v13 = vadd.f32 %v1334_v53, %v1333_v5  ;;  %v1581_v14 = vadd.f32 %v1580_v54, %v1579_v6  ;;  %v1571_v16 = vadd.f32 %v1570_v52, %v1569_v62  ;;  %v1755_v5 = vld [vmem:[%s3985_s10] sm:$0xff]  ;;  %v1756_v6 = vld [vmem:[%s3985_s10 + $0x8] sm:$0xff]  ;;  %v1757_v63 = vld [vmem:[%s3985_s10 + $0x10] sm:$0xff] }
 0x54a   : > { %v1576_v17 = vadd.f32 %v1575_v57, %v1574_v2  ;;  %v1330_v18 = vadd.f32 %v1329_v58, %v1328_v4  ;;  %v1586_v21 = vsel %vm1543_vm12, %v1541_v8, 0.0  ;;  %v2863_v2 = vld [vmem:[%s580_s11] sm:$0xff]  ;;  %v2709_v52 = vpack.c.bf16 %v1756_v6, %v1755_v5  ;;  %v1758_v53 = vld [vmem:[%s3985_s10 + $0x18] sm:$0xff] }
 0x54b   : > { %v1624_v22 = vsel %vm1191_vm2, %v1557_v3, %v1550_v56  ;;  %v1336_v23 = vrot.slane %v1335_v13, 2  ;;  %v1582_v24 = vrot.slane %v1581_v14, 2  ;;  %v1587_v25 = vrot.slane %v1586_v21, 4  ;;  %v1534_v26 = vpop.permute.xlu0 %1533  ;;  %v1760_v56 = vld [vmem:[%s3985_s10 + $0x28] sm:$0xff] }
 0x54c   : > { %v1625_v27 = vsel %vm1193_vm3, %v1564_v19, %v1624_v22  ;;  %v1577_v28 = vrot.slane %v1576_v17, 1  ;;  %v1331_v29 = vrot.slane %v1330_v18, 1  ;;  %v1542_v33 = vmul.f32 %v3735_v31, %v1534_v26  ;;  %2710 = vmatpush3.bf16.msra.mxu0 %v2709_v52  ;;  %v1765_v22 = vld [vmem:[%s3985_s10 + $0x50] sm:$0xff]  ;;  %v1772_v26 = vld [vmem:[%s4036_s25 + $0x8] sm:$0xff] }
 0x54d   : > { %v1626_v30 = vsel %vm1195_vm4, %v1571_v16, %v1625_v27  ;;  %v1337_v61 = vadd.f32 %v1336_v23, %v1335_v13  ;;  %v1583_v32 = vadd.f32 %v1582_v24, %v1581_v14  ;;  %v1588_v10 = vadd.f32 %v1587_v25, %v1586_v21  ;;  %2711 = vmatprep.subr.bf16.mxu0 %v3189_v0  ;;  %v1761_v13 = vld [vmem:[%s3985_s10 + $0x30] sm:$0xff]  ;;  %v1762_v14 = vld [vmem:[%s3985_s10 + $0x38] sm:$0xff]  ;;  %v1771_v25 = vld [vmem:[%s4036_s25] sm:$0xff] }
 0x54e   : > { %v1578_v34 = vadd.f32 %v1577_v28, %v1576_v17  ;;  %v1332_v12 = vadd.f32 %v1331_v29, %v1330_v18  ;;  %v1593_v35 = vsel %vm1543_vm12, %v1542_v33, 0.0  ;;  %v2712_v54 = vpack.c.bf16 %v1758_v53, %v1757_v63  ;;  %v1763_v17 = vld [vmem:[%s3985_s10 + $0x40] sm:$0xff]  ;;  %v1764_v18 = vld [vmem:[%s3985_s10 + $0x48] sm:$0xff]  ;;  %v1766_v23 = vld [vmem:[%s3985_s10 + $0x58] sm:$0xff] }
 0x54f   : > { %v1338_v36 = vrot.slane %v1337_v61, 1  ;;  %v1584_v37 = vrot.slane %v1583_v32, 1  ;;  %v1589_v38 = vrot.slane %v1588_v10, 2  ;;  %v1594_v39 = vrot.slane %v1593_v35, 4  ;;  %v1767_v28 = vld [vmem:[%s3985_s10 + $0x60] sm:$0xff]  ;;  %v1768_v29 = vld [vmem:[%s3985_s10 + $0x68] sm:$0xff] }
 0x550   : > { %v1627_v40 = vsel %vm1197_vm5, %v1578_v34, %v1626_v30  ;;  %v1613_v41 = vsel %vm1201_vm7, %v1332_v12, %v3771_v15  ;;  %2713 = vmatpush3.bf16.msra.mxu0 %v2712_v54  ;;  %v2715_v57 = vpack.c.bf16 %v1760_v56, %v1759_v55  ;;  %v2718_v16 = vpack.c.bf16 %v1762_v14, %v1761_v13  ;;  %v1773_v30 = vld [vmem:[%s4036_s25 + $0x10] sm:$0xff]  ;;  %v1770_v34 = vld [vmem:[%s3985_s10 + $0x78] sm:$0xff] }
 0x551   : > { %v1339_v9 = vadd.f32 %v1338_v36, %v1337_v61  ;;  %v1585_v31 = vadd.f32 %v1584_v37, %v1583_v32  ;;  %v1590_v42 = vadd.f32 %v1589_v38, %v1588_v10  ;;  %v1595_v11 = vadd.f32 %v1594_v39, %v1593_v35  ;;  %2714 = vmatprep.subr.bf16.mxu0 %v3189_v0  ;;  %v1774_v61 = vld [vmem:[%s4036_s25 + $0x18] sm:$0xff]  ;;  %v1769_v10 = vld [vmem:[%s3985_s10 + $0x70] sm:$0xff]  ;;  %v2254_v39 = vld [vmem:[%s4037_s18] ss:$0 sm:$0xff]  ;;  %s3064_s18 = scalar_lea.vmem %s2046_s13, 128 }
 0x552   : > { %v2721_v21 = vpack.c.bf16 %v1764_v18, %v1763_v17  ;;  %v2724_v24 = vpack.c.bf16 %v1766_v23, %v1765_v22  ;;  %v2703_v27 = vpack.c.bf16 %v1772_v26, %v1771_v25  ;;  %v2727_v33 = vpack.c.bf16 %v1768_v29, %v1767_v28  ;;  %p3065_p2 = scmp.ne.s32.totalorder %s2046_s13, %s3064_s18 }
 0x553   : > { %v1628_v43 = vsel %vm1199_vm6, %v1585_v31, %v1627_v40  ;;  %v1591_v44 = vrot.slane %v1590_v42, 1  ;;  %v1596_v45 = vrot.slane %v1595_v11, 2  ;;  %v1614_v46 = vsel %vm1203_vm8, %v1339_v9, %v1613_v41  ;;  %v2255_v41 = vld [vmem:[%s4038_s28] ss:$0 sm:$0xff]  ;;  %s3070_s28 = scalar_lea.vmem %s3069_s8, 256 }
 0x554   : > { %2716 = vmatpush3.bf16.msra.mxu0 %v2715_v57  ;;  %v2706_v32 = vpack.c.bf16 %v1774_v61, %v1773_v30  ;;  %v2730_v12 = vpack.c.bf16 %v1770_v34, %v1769_v10  ;;  %p3066_p10 = pnand %p3065_p2, %p4041_p6  ;;  %p3072_p3 = scmp.lt.s32.totalorder %s3070_s28, %s3064_s18 }
 0x555   : > { %v1592_v47 = vadd.f32 %v1591_v44, %v1590_v42  ;;  %v1597_v7 = vadd.f32 %v1596_v45, %v1595_v11  ;;  %2717 = vmatprep.subr.bf16.mxu0 %v3189_v0  ;;  %v1928_v42 = vld [vmem:[#allocation13] sm:$0xff]  ;;  %v1929_v11 = vld [vmem:[#allocation13 + $0x8] sm:$0xff]  ;;  %v1930_v45 = vld [vmem:[#allocation13 + $0x10] sm:$0xff] }
 0x556   : > { %p3067_p5 = pneg %p3066_p10  ;;  %p3073_p7 = por %p3072_p3, %p3071_p9 }
 0x557   : > { %v1598_v48 = vrot.slane %v1597_v7, 1  ;;  %v1629_v49 = vsel %vm1201_vm7, %v1592_v47, %v1628_v43 }
 0x558   : > { %2719 = vmatpush3.bf16.msra.mxu0 %v2718_v16  ;;  %p3074_p11 = pnand %p3073_p7, %p3067_p5 }
 0x559   : > { %v1599_v50 = vadd.f32 %v1598_v48, %v1597_v7  ;;  %2720 = vmatprep.subr.bf16.mxu0 %v3189_v0  ;;  %v2257_v48 = vld [vmem:[%s4039_s12] ss:$0 sm:$0xff] }
 0x55b   : > { %v1630_v51 = vsel %vm1203_vm8, %v1599_v50, %v1629_v49 }
 0x55c   : > { %v1632_v15 = vsel %vm1115_vm1, %v1614_v46, %v1630_v51  ;;  %2722 = vmatpush3.bf16.msra.mxu0 %v2721_v21  ;;  %v1931_v46 = vld [vmem:[#allocation13 + $0x18] sm:$0xff] }
 0x55d   : > { %2531 = vmatmul.mubr.f32.vlgmr.msra.gmra.mrb[8].mxu1 %v1632_v15  ;;  %2723 = vmatprep.subr.bf16.mxu0 %v3189_v0  ;;  %v2736_v47 = vpack.c.bf16 %v1931_v46, %v1930_v45 }
 0x55e   : > { %2541 = vmatprep.mubr.msk.f32.mxu1 %vm3190_vm0, %v3191_v1  ;;  %2704 = vmatpush3.bf16.msra.mxu1 %v2703_v27 }
 0x55f   : > { %2705 = vmatprep.subr.bf16.mxu1 %v3189_v0 }
 0x560   : > { %2725 = vmatpush3.bf16.msra.mxu0 %v2724_v24 }
 0x561   : > { %2726 = vmatprep.subr.bf16.mxu0 %v3189_v0 }
 0x562   : > { %2707 = vmatpush3.bf16.msra.mxu1 %v2706_v32 }
 0x563   : > { %2732 = vmatprep.subr.bf16.mxu1 %v3189_v0 }
 0x564   : > { %2728 = vmatpush3.bf16.msra.mxu0 %v2727_v33 }
 0x565   : > { %2729 = vmatprep.subr.bf16.mxu0 %v3189_v0  ;;  %2542 = vmatmul.mubr.msk.f32.vlgmr.msra.gmra.mrb[10].mxu1 %vm1775_vm13, %v2863_v2 }
 0x566   : > { %2587 = vmatprep.mubr.msk.f32.mxu1 %vm3190_vm0, %v3191_v1  ;;  %v2733_v1 = vpack.c.bf16 %v1929_v11, %v1928_v42 }
 0x568   : > { %2731 = vmatpush3.bf16.msra.mxu0 %v2730_v12  ;;  %2734 = vmatpush3.bf16.msra.mxu1 %v2733_v1 }
 0x569   : > { %2735 = vmatprep.subr.bf16.mxu1 %v3189_v0 }
 0x56c   : > { %2737 = vmatpush3.bf16.msra.mxu1 %v2736_v47 }
 0x630   : > { %v1722_v59 = vpop.f32.mrb[8].mxu1 }
 0x631   : > { %v1723_v60 = vadd.f32 %v2253_v20, %v1722_v59  ;;  %v2532_v62 = vpop.f32.mrb[9].mxu1 }
 0x633   : > { %v1726_v4 = vadd.f32 %v2863_v2, %v1723_v60 }
 0x635   : > { %1727 = vadd.xlane.f32.xlu1 %v1726_v4 }
 0x638   : > { %v1845_v43 = vpop.f32.mrb[10].mxu1 }
 0x639   : > { %v2543_v44 = vpop.f32.mrb[11].mxu1 }
 0x6c2   : > { %v1728_v58 = vpop.xlane.xlu1 %1727 }
 0x6c3   : > { %v1730_v8 = vmul.f32 0.0078125, %v1728_v58 }
 0x6c5   : > { %v1731_v19 = vsub.f32 %v1726_v4, %v1730_v8 }
 0x6c7   : > { %v1732_v3 = vmul.f32 %v1731_v19, %v1731_v19 }
 0x6c9   : > { %1733 = vadd.xlane.f32.xlu0 %v1732_v3 }
 0x756   : > { %v1734_v35 = vpop.xlane.xlu0 %1733 }
 0x757   : > { %v1735_v36 = vmul.f32 0.0078125, %v1734_v35 }
 0x759   : > { %v1736_v37 = vadd.f32 1e-05, %v1735_v36 }
 0x75b   : > { %2861 = vrsqrt.f32 %v1736_v37 }
 0x765   : > { %v2862_v38 = vpop.eup %2861 }
 0x766   : > { %v1738_v40 = vmul.f32 %v2862_v38, %v1731_v19 }
 0x768   : > { %v1746_v9 = vmul.f32 %v2254_v39, %v1738_v40 }
 0x76a   : > { %v1754_v31 = vadd.f32 %v2255_v41, %v1746_v9 }
 0x76c   : > { %2577 = vmatmul.mubr.f32.vlgmr.msra.gmra.mrb[10].mxu0 %v1754_v31 }
 0x83f   : > { %v1915_v7 = vpop.f32.mrb[10].mxu0 }
 0x840   : > { %v1916_v49 = vadd.f32 %v1915_v7, %v1845_v43  ;;  %v2578_v50 = vpop.f32.mrb[11].mxu0 }
 0x842   : > { %v1926_v51 = vadd.f32 %v2257_v48, %v1916_v49 }
 0x844   : > { %v1927_v15 = vmax.f32 %v1926_v51, 0.0 }
 0x846   : > { %2588 = vmatmul.mubr.msk.f32.vlgmr.msra.gmra.mrb[12].mxu1 %vm1775_vm13, %v1927_v15 }
 0x847   : > { %3077 = shalt.err (!%p3074_p11)
}
 0x848   : > { %s3078_s20 = scalar_lea.hbm %s3900_s5, 128  ;;  %s3082_s12 = scalar_lea.hbm %s4040_s16, 256 }
 0x849   : > { %p3079_p8 = scmp.ne.s32.totalorder %s3900_s5, %s3078_s20  ;;  %p3083_p1 = scmp.lt.u32.totalorder %s3900_s5, %s4040_s16 }
 0x84a   : > { %p3084_p13 = scmp.lt.u32.totalorder %s3082_s12, %s3078_s20  ;;  %p3086_p2 = scmp.lt.u32.totalorder %s3078_s20, %s3900_s5 }
 0x84b   : > { %p3080_p4 = pnand %p3079_p8, %p4041_p6 }
 0x84c   : > { %p3085_p0 = por %p3084_p13, %p3083_p1 }
 0x84d   : > { %p3081_p12 = pneg %p3080_p4 }
 0x84e   : > { %p3087_p10 = por %p3086_p2, %p3085_p0 }
 0x850   : > { %p3088_p5 = pnand %p3087_p10, %p3081_p12 }
 0x852   : > { %3091 = shalt.err (!%p3088_p5)
}
 0x853   : > { %2763 = dma.vmem_to_hbm [thread:$0]  (%p4041_p6), %s2046_s13, 128, %s3900_s5, %s2019_s26  }
 0x854   : > { %s4042_s8 = sld [smem:[#allocation35_spill]]  ;;  %s665_s28 = scalar_lea.vmem [#allocation14], %s3557_s6 }
 0x855   : > { %s2032_s0 = sshll.u32 %s665_s28, 4  ;;  %s4043_s12 = sld [smem:[#allocation36_spill]]  ;;  %s3932_s0 = int_to_ptr.vmem [resolvable:$true] %s2032_s0 }
 0x856   : > { %s2014_s5 = scalar_lea.sflag [#allocation4], %s3554_s4  ;;  %s3092_s13 = scalar_lea.vmem %s3932_s0, 128 }
 0x857   : > { %p3093_p9 = scmp.ne.s32.totalorder %s3932_s0, %s3092_s13  ;;  %s3196_s6 = smov [#allocation14]  }
 0x858   : > { %s3096_s27 = sshll.u32 %s3196_s6, 4  ;;  %s3097_s27 = int_to_ptr.vmem [resolvable:$false] %s3096_s27 }
 0x859   : > { %p3094_p3 = pnand %p3093_p9, %p4041_p6  ;;  %s3098_s26 = scalar_lea.vmem %s3097_s27, 256 }
 0x85a   : > { %v2258_v0 = vld [vmem:[%s4042_s8] ss:$0 sm:$0xff]  ;;  %p3099_p11 = scmp.lt.s32.totalorder %s3932_s0, %s3097_s27  ;;  %p3100_p8 = scmp.lt.s32.totalorder %s3098_s26, %s3092_s13 }
 0x85b   : > { %s3930_s3 = scalar_lea.hbm %s4043_s12, %s2262_s9  ;;  %p3095_p7 = pneg %p3094_p3 }
 0x85c   : > { %p3101_p4 = por %p3100_p8, %p3099_p11 }
 0x85e   : > { %p3102_p12 = pnand %p3101_p4, %p3095_p7 }
 0x919   : > { %v2008_v20 = vpop.f32.mrb[12].mxu1 }
 0x91a   : > { %v2009_v59 = vadd.f32 %v2258_v0, %v2008_v20  ;;  %v2589_v60 = vpop.f32.mrb[13].mxu1 }
 0x91c   : > { %2012 = vst.msk [vmem:[%s665_s28] sm:$0xff] %vm1775_vm13, %v2009_v59 }
 0x91d   : > { %3105 = shalt.err (!%p3102_p12)
}
 0x91e   : > { %s3106_s4 = scalar_lea.hbm %s3930_s3, 128  ;;  %s3110_s18 = scalar_lea.hbm %s4043_s12, 256 }
 0x91f   : > { %p3107_p1 = scmp.ne.s32.totalorder %s3930_s3, %s3106_s4  ;;  %p3111_p2 = scmp.lt.u32.totalorder %s3930_s3, %s4043_s12 }
 0x920   : > { %p3112_p10 = scmp.lt.u32.totalorder %s3110_s18, %s3106_s4  ;;  %p3114_p9 = scmp.lt.u32.totalorder %s3106_s4, %s3930_s3 }
 0x921   : > { %p3108_p13 = pnand %p3107_p1, %p4041_p6 }
 0x922   : > { %p3113_p5 = por %p3112_p10, %p3111_p2 }
 0x923   : > { %p3109_p0 = pneg %p3108_p13 }
 0x924   : > { %p3115_p3 = por %p3114_p9, %p3113_p5 }
 0x926   : > { %p3116_p7 = pnand %p3115_p3, %p3109_p0 }
 0x928   : > { %3119 = shalt.err (!%p3116_p7)
}
 0x929   : > { %2762 = dma.vmem_to_hbm [thread:$0]  (%p4041_p6), %s3932_s0, 128, %s3930_s3, %s2014_s5  }
 0x92a PF: > { %s2057_s28 = sand.u32 1, %s3166_s21   ;;  %p4044_p11 = scmp.ne.s32.totalorder %s4025_s19, 0 }
 0x92b   : > { %p4045_p8 = scmp.ge.s32.totalorder %s3178_s24, 2  ;;  %s2058_s20 = scalar_lea.sflag [#allocation4], %s2057_s28 }
 0x92d   : > { %p2790_p4 = pnand %p4045_p8, %p4044_p11 }
 0x92f   : > { %3157 = dma.done.wait (!%p2790_p4), %s2058_s20, 128  }
 0x930   : > { %3159 = vsyncadd (!%p2790_p4), %s2058_s20, 4294967168  ;;  %s2067_s17 = scalar_lea.sflag [#allocation16], %s2057_s28 }
 0x931   : > { %3161 = dma.done.wait (!%p2790_p4), %s2067_s17, 128  }
 0x932   : > { %3163 = vsyncadd (!%p2790_p4), %s2067_s17, 4294967168  ;;  %s4046_s15 = sld [smem:[#allocation24_spill]]  ;;  %p38_p6 = scmp.ge.s32.totalorder %s3455_s29, 4  }
 0x933   : > { %s4047_s21 = smov %s3170_s22  ;;  %s4048_s22 = smov %s3174_s23 }
 0x934   : > { %s4050_s24 = smov %s3455_s29  ;;  %40 = sbr.rel (!%p38_p6) target bundleno = 25 (0x19), region = 178 }
 0x938   : > { %s4049_s23 = smov %s4046_s15 }
 0x93b   :  { %2072 = vsyncpa [#allocation3], 1 }
 0x93c   :  { %2074 = vsyncpa [#allocation3 + $0x1], 1 }
 0x93d   :  { %2075 = vsyncpa [#allocation6], 1 }
 0x93e   :  { %2077 = vsyncpa [#allocation6 + $0x1], 1 }
 0x93f   :  { %2078 = vsyncpa [#allocation9], 1 }
 0x940   :  { %2079 = vsyncpa [#allocation12], 1 }
 0x941   :  { %2080 = vsyncpa [#allocation4], 1 }
 0x942   :  { %2082 = vsyncpa [#allocation4 + $0x1], 1 }
 0x943   :  { %2083 = vsyncpa [#allocation16], 1 }
 0x944   :  { %2085 = vsyncpa [#allocation16 + $0x1], 1 }

</bundles_post_ra>
